<compile_context>
chip_gen: v6e
topology: v6e:2x2x1
jax: 0.10.0
libtpu: 0.0.40
codegen_flags: <defaults>
</compile_context>

<pallas_src>
import functools

import numpy as np
import jax
import jax.numpy as jnp
from jax import lax
from jax.experimental import pallas as pl
from jax.experimental.pallas import tpu as pltpu

EPS = 1e-5
# MXU operand dtype.  jnp.bfloat16 gives ~2x MXU throughput on v6e/v7x and halves the
# im2col VMEM store traffic (relieves v5e's single vst slot); accumulation, BN and ReLU
# stay f32 either way.  f32 is the default here to keep exact 1e-4 parity with the f32
# reference (at Cout=8 the kernels are launch/DMA-bound, not MXU-bound, so bf16 buys
# little at this size).  Switching requires relaxing the allclose tolerance.
MXU_DTYPE = jnp.float32

# Per-grid-step lane budget for the fused (channels, B_tile*H*W) blocks, plus a VMEM cap
# on the im2col scratch.  Keeps blocks a few hundred KiB (high DMA efficiency) while
# staying far below the 16 MiB scoped-VMEM default of v5e (32 MiB on v6e/v7x).
_TARGET_LANES = 2048
_COL_BYTES_BUDGET = 6 << 20


# ---------------------------------------------------------------------------
# small helpers
# ---------------------------------------------------------------------------
def _round_up(x, m):
    return (x + m - 1) // m * m


def _pick_b_tile(n, hw, k_rows):
    """Largest divisor of n whose fused block stays within the lane / VMEM budget."""
    itemsize = np.dtype(MXU_DTYPE).itemsize
    best = 1
    for b in range(1, n + 1):
        if n % b:
            continue
        if b * hw <= _TARGET_LANES and k_rows * b * hw * itemsize <= _COL_BYTES_BUDGET:
            best = b
    return best


# ---------------------------------------------------------------------------
# kernels
# ---------------------------------------------------------------------------
def _taps_to_col(pad_ref, mask_ref, col_ref, offsets, length):
    """col[t*C:(t+1)*C, :] = lane-shifted, edge-masked view of the flat padded row.

    C (= pad_ref rows) is padded to a multiple of 8, so every tap store is
    8-sublane aligned (full-vreg unmasked stores)."""
    c = pad_ref.shape[0]
    for t, off in enumerate(offsets):                      # 9 static taps
        col_ref[t * c:(t + 1) * c, :] = (
            pad_ref[:, off:off + length] * mask_ref[t:t + 1, :]
        ).astype(col_ref.dtype)


def _fold_scale_bias(stats, gb, count):
    """(C, 2) summed BN partials + (C, 2) gamma/beta -> (C, 1) scale, (C, 1) bias.

    Tiny O(C) fold, recomputed on every grid step (megacore / grid-shard safe)."""
    mean = stats[:, 0:1] / count
    var = jnp.maximum(stats[:, 1:2] / count - mean * mean, 0.0)
    scale = gb[:, 0:1] * lax.rsqrt(var + EPS)
    bias = gb[:, 1:2] - mean * scale
    return scale, bias


def _conv1_shortcut_kernel(x_ref, wcat_ref, mask_ref,          # inputs
                           y1_ref, sc_ref, stats_ref,          # outputs
                           pad_ref, col_ref,                   # scratch
                           *, offsets, padw, hw, cout_p):
    """pass 1: conv1 and the 1x1 shortcut as ONE fused GEMM over B_tile images
    (concatenated along lanes) + per-tile BN partial statistics (single store)."""
    b_tile, cin, _ = x_ref.shape
    cin_p = pad_ref.shape[0]
    length = b_tile * hw
    # zero only the two (W+1)-wide lane halos (+ the channel-pad rows), then copy x in,
    # one lane-dense (Cin, HW) slab per image.
    pad_ref[:, 0:padw] = jnp.zeros((cin_p, padw), jnp.float32)
    pad_ref[:, padw + length:] = jnp.zeros((cin_p, padw), jnp.float32)
    if cin_p > cin:
        pad_ref[cin:, padw:padw + length] = jnp.zeros((cin_p - cin, length), jnp.float32)
    for b in range(b_tile):
        pad_ref[0:cin, padw + b * hw: padw + (b + 1) * hw] = x_ref[b]
    _taps_to_col(pad_ref, mask_ref, col_ref, offsets, length)
    out = jnp.dot(wcat_ref[...], col_ref[...],
                  preferred_element_type=jnp.float32)          # (2*Cout_p, B_tile*HW)
    y1_ref[0] = out[:cout_p, :]
    sc_ref[0] = out[cout_p:, :]
    # per-tile partial BN statistics in one store: column 0 = sum, column 1 = sum of sq
    stats_ref[0] = jnp.concatenate(
        [jnp.sum(out, axis=1, keepdims=True),
         jnp.sum(out * out, axis=1, keepdims=True)], axis=1)


def _conv2_kernel(y1_ref, w2_ref, stats1_ref, gb1_ref, mask_ref,   # inputs
                  y2_ref, stats_ref,                               # outputs
                  pad_ref, col_ref,                                # scratch
                  *, offsets, padw, count, cout_p):
    """pass 2: in-kernel BN1 fold (O(C)) + fused scale/bias + ReLU, then conv2 as one
    GEMM over the fused B_tile*HW lanes + BN2 partial statistics."""
    length = y1_ref.shape[2]
    s1 = jnp.sum(stats1_ref[...], axis=0)                          # (2*Cout_p, 2)
    scale, bias = _fold_scale_bias(s1[:cout_p, :], gb1_ref[...], count)
    h = jnp.maximum(y1_ref[0] * scale + bias, 0.0)                 # (Cout_p, B_tile*HW)
    pad_ref[:, 0:padw] = jnp.zeros((cout_p, padw), jnp.float32)
    pad_ref[:, padw + length:] = jnp.zeros((cout_p, padw), jnp.float32)
    pad_ref[:, padw:padw + length] = h
    _taps_to_col(pad_ref, mask_ref, col_ref, offsets, length)
    y2 = jnp.dot(w2_ref[...], col_ref[...],
                 preferred_element_type=jnp.float32)               # (Cout_p, B_tile*HW)
    y2_ref[0] = y2
    stats_ref[0] = jnp.concatenate(
        [jnp.sum(y2, axis=1, keepdims=True),
         jnp.sum(y2 * y2, axis=1, keepdims=True)], axis=1)


def _epilogue_kernel(y2_ref, sc_ref, stats1_ref, stats2_ref, gb2_ref, gbs_ref,  # inputs
                     o_ref,                                                     # output
                     *, hw, count, cout_p):
    """pass 3: in-kernel BN2 + shortcut-BN folds, fused scale/bias, add, ReLU, then
    scatter back to per-image (N, Cout, H*W) layout with lane-dense stores."""
    s2 = jnp.sum(stats2_ref[...], axis=0)                          # (Cout_p, 2)
    s1 = jnp.sum(stats1_ref[...], axis=0)                          # (2*Cout_p, 2)
    sc2, b2 = _fold_scale_bias(s2, gb2_ref[...], count)
    scs, bs = _fold_scale_bias(s1[cout_p:, :], gbs_ref[...], count)
    r = jnp.maximum((y2_ref[0] * sc2 + b2) + (sc_ref[0] * scs + bs), 0.0)
    b_tile, cout, _ = o_ref.shape
    for b in range(b_tile):
        o_ref[b] = r[0:cout, b * hw:(b + 1) * hw]


# ---------------------------------------------------------------------------
# wrapper helpers
# ---------------------------------------------------------------------------
def _tap_masks(H, W):
    """(9, H*W) 0/1 masks: 1 where the (dy, dx)-shifted tap stays inside the image."""
    hh = jnp.arange(H * W, dtype=jnp.int32) // W
    ww = jnp.arange(H * W, dtype=jnp.int32) % W
    rows = []
    for dy in (-1, 0, 1):
        for dx in (-1, 0, 1):
            ok = (hh + dy >= 0) & (hh + dy < H) & (ww + dx >= 0) & (ww + dx < W)
            rows.append(ok.astype(jnp.float32))
    return jnp.stack(rows, axis=0)


def _pack_conv3x3(w_hwio, cin_p, cout_p):
    """(3,3,Cin,Cout) HWIO -> (Cout_p, 9*Cin_p) GEMM weights, tap-major, zero-padded."""
    k1, k2, cin, cout = w_hwio.shape
    w = jnp.transpose(w_hwio.reshape(k1 * k2, cin, cout), (2, 0, 1))   # (Cout, 9, Cin)
    return (jnp.zeros((cout_p, k1 * k2, cin_p), jnp.float32)
            .at[:cout, :, :cin].set(w).reshape(cout_p, k1 * k2 * cin_p))


def _pack_gamma_beta(g, b, cout_p):
    """gamma/beta -> (Cout_p, 2): col 0 = gamma, col 1 = beta (zero in padded rows)."""
    g = g.reshape(-1)
    b = b.reshape(-1)
    cout = g.shape[0]
    return (jnp.zeros((cout_p, 2), jnp.float32)
            .at[:cout, 0].set(g).at[:cout, 1].set(b))


@jax.jit
def residual_block(x_nchw, params):
    N, Cin, H, W = x_nchw.shape
    Cout = params["w1"].shape[-1]
    HW = H * W
    PADW = W + 1
    Cin_p = _round_up(Cin, 8)                  # 8-sublane aligned tap blocks (f32)
    Cout_p = _round_up(Cout, 8)
    itm = np.dtype(MXU_DTYPE).itemsize

    B = _pick_b_tile(N, HW, 9 * max(Cin_p, Cout_p))    # images fused per grid step
    G = N // B                                         # grid size (groups)
    L = B * HW                                         # lanes per fused block
    count = float(N * HW)                              # BN normalization count (N*H*W)

    # free contiguous relayout: NCHW -> (N, C, H*W); no wrapper transposes, and the
    # minor dim keeps every HBM block lane-dense (full 128-lane vregs, unmasked vst).
    x = x_nchw.reshape(N, Cin, HW).astype(jnp.float32)

    # GEMM-form weights, channel-padded to the 8-sublane grid.  The 1x1 shortcut uses
    # only the centre tap (t=4) and is fused into the conv1 GEMM as rows [Cout_p:2*Cout_p).
    w1m = _pack_conv3x3(params["w1"], Cin_p, Cout_p)
    wsm = (jnp.zeros((Cout_p, 9, Cin_p), jnp.float32)
           .at[:Cout, 4, :Cin].set(params["ws"].T).reshape(Cout_p, 9 * Cin_p))
    wcat = jnp.concatenate([w1m, wsm], axis=0).astype(MXU_DTYPE)       # (2*Cout_p, 9*Cin_p)
    w2m = _pack_conv3x3(params["w2"], Cout_p, Cout_p).astype(MXU_DTYPE)

    gb1 = _pack_gamma_beta(params["g1"], params["b1"], Cout_p)
    gb2 = _pack_gamma_beta(params["g2"], params["b2"], Cout_p)
    gbs = _pack_gamma_beta(params["gs"], params["bs"], Cout_p)

    # per-image tap masks, tiled across the B_tile images that share a block's lanes;
    # they also zero any tap that would leak across an image boundary inside the slab.
    masks = jnp.tile(_tap_masks(H, W), (1, B))                          # (9, L)
    offsets = tuple(PADW + dy * W + dx for dy in (-1, 0, 1) for dx in (-1, 0, 1))

    cp = pltpu.CompilerParams(dimension_semantics=("parallel",))       # v7x: 2 TCs/chip
    rep = lambda shape: pl.BlockSpec(shape, lambda i: (0,) * len(shape))
    grp = lambda c: pl.BlockSpec((1, c, L), lambda i: (i, 0, 0))        # fused-group acts
    img = lambda c: pl.BlockSpec((B, c, HW), lambda i: (i, 0, 0))       # per-image acts
    st = lambda c: pl.BlockSpec((1, c, 2), lambda i: (i, 0, 0))         # BN partials

    # ---- pass 1: conv1 + 1x1 shortcut (single fused GEMM over B images) + BN partials --
    cost1 = pl.CostEstimate(
        flops=2 * (2 * Cout_p) * (9 * Cin_p) * N * HW,
        transcendentals=0,
        bytes_accessed=(4 * N * Cin * HW + itm * (2 * Cout_p) * (9 * Cin_p)
                        + 4 * 9 * L + 4 * 2 * G * Cout_p * L + 4 * G * 2 * Cout_p * 2))
    y1_pre, sc_pre, stats1 = pl.pallas_call(
        functools.partial(_conv1_shortcut_kernel,
                          offsets=offsets, padw=PADW, hw=HW, cout_p=Cout_p),
        grid=(G,),
        in_specs=[img(Cin), rep((2 * Cout_p, 9 * Cin_p)), rep((9, L))],
        out_specs=[grp(Cout_p), grp(Cout_p), st(2 * Cout_p)],
        out_shape=[jax.ShapeDtypeStruct((G, Cout_p, L), jnp.float32),
                   jax.ShapeDtypeStruct((G, Cout_p, L), jnp.float32),
                   jax.ShapeDtypeStruct((G, 2 * Cout_p, 2), jnp.float32)],
        scratch_shapes=[pltpu.VMEM((Cin_p, L + 2 * PADW), jnp.float32),
                        pltpu.VMEM((9 * Cin_p, L), MXU_DTYPE)],
        compiler_params=cp,
        cost_estimate=cost1,
    )(x, wcat, masks)

    # ---- pass 2: in-kernel BN1 fold + ReLU -> conv2 (single GEMM) + BN2 partials -------
    cost2 = pl.CostEstimate(
        flops=2 * Cout_p * (9 * Cout_p) * N * HW + 6 * N * Cout_p * HW,
        transcendentals=G * Cout_p,
        bytes_accessed=(4 * 2 * G * Cout_p * L + itm * Cout_p * 9 * Cout_p
                        + 4 * 9 * L + 4 * G * 3 * Cout_p * 2 + 4 * Cout_p * 2))
    y2_pre, stats2 = pl.pallas_call(
        functools.partial(_conv2_kernel,
                          offsets=offsets, padw=PADW, count=count, cout_p=Cout_p),
        grid=(G,),
        in_specs=[grp(Cout_p), rep((Cout_p, 9 * Cout_p)),
                  rep((G, 2 * Cout_p, 2)), rep((Cout_p, 2)), rep((9, L))],
        out_specs=[grp(Cout_p), st(Cout_p)],
        out_shape=[jax.ShapeDtypeStruct((G, Cout_p, L), jnp.float32),
                   jax.ShapeDtypeStruct((G, Cout_p, 2), jnp.float32)],
        scratch_shapes=[pltpu.VMEM((Cout_p, L + 2 * PADW), jnp.float32),
                        pltpu.VMEM((9 * Cout_p, L), MXU_DTYPE)],
        compiler_params=cp,
        cost_estimate=cost2,
    )(y1_pre, w2m, stats1, gb1, masks)

    # ---- pass 3: BN2 + shortcut-BN folds, add, ReLU, scatter back to (N, Cout, HW) -----
    cost3 = pl.CostEstimate(
        flops=10 * N * Cout_p * HW,
        transcendentals=2 * G * Cout_p,
        bytes_accessed=4 * (2 * G * Cout_p * L + N * Cout * HW
                            + G * 3 * Cout_p * 2 + 2 * Cout_p * 2))
    out = pl.pallas_call(
        functools.partial(_epilogue_kernel, hw=HW, count=count, cout_p=Cout_p),
        grid=(G,),
        in_specs=[grp(Cout_p), grp(Cout_p), rep((G, 2 * Cout_p, 2)),
                  rep((G, Cout_p, 2)), rep((Cout_p, 2)), rep((Cout_p, 2))],
        out_specs=img(Cout),
        out_shape=jax.ShapeDtypeStruct((N, Cout, HW), jnp.float32),
        compiler_params=cp,
        cost_estimate=cost3,
    )(y2_pre, sc_pre, stats1, stats2, gb2, gbs)

    return out.reshape(N, Cout, H, W)          # free reshape back to NCHW


# ---------------------------------------------------------------------------
# pure-JAX reference (training-mode BN, matches the PyTorch forward)
# ---------------------------------------------------------------------------
def reference(x_nchw, params):
    x = jnp.transpose(x_nchw, (0, 2, 3, 1)).astype(jnp.float32)
    Cin = x.shape[-1]
    Cout = params["w1"].shape[-1]

    def conv(a, w, pad):
        return lax.conv_general_dilated(
            a, w, window_strides=(1, 1), padding=[(pad, pad), (pad, pad)],
            dimension_numbers=("NHWC", "HWIO", "NHWC"))

    def bn(y, g, b):
        mean = jnp.mean(y, axis=(0, 1, 2), keepdims=True)
        var = jnp.mean((y - mean) ** 2, axis=(0, 1, 2), keepdims=True)
        return (y - mean) / jnp.sqrt(var + EPS) * g.reshape(1, 1, 1, -1) \
            + b.reshape(1, 1, 1, -1)

    h = jax.nn.relu(bn(conv(x, params["w1"], 1), params["g1"], params["b1"]))
    h = bn(conv(h, params["w2"], 1), params["g2"], params["b2"])
    s = bn(conv(x, params["ws"].reshape(1, 1, Cin, Cout), 0),
           params["gs"], params["bs"])
    return jnp.transpose(jax.nn.relu(h + s), (0, 3, 1, 2))


def make_params(key, in_channels, out_channels):
    ks = jax.random.split(key, 8)
    w1 = 0.1 * jax.random.normal(ks[0], (3, 3, in_channels, out_channels), jnp.float32)
    w2 = 0.1 * jax.random.normal(ks[1], (3, 3, out_channels, out_channels), jnp.float32)
    ws = 0.1 * jax.random.normal(ks[2], (in_channels, out_channels), jnp.float32)
    g1 = 1.0 + 0.1 * jax.random.normal(ks[3], (1, out_channels), jnp.float32)
    b1 = 0.1 * jax.random.normal(ks[4], (1, out_channels), jnp.float32)
    g2 = 1.0 + 0.1 * jax.random.normal(ks[5], (1, out_channels), jnp.float32)
    b2 = 0.1 * jax.random.normal(ks[6], (1, out_channels), jnp.float32)
    gs = jnp.ones((1, out_channels), jnp.float32)
    bs = jnp.zeros((1, out_channels), jnp.float32)
    return dict(w1=w1, w2=w2, ws=ws, g1=g1, b1=b1, g2=g2, b2=b2, gs=gs, bs=bs)


if __name__ == "__main__":
    key = jax.random.PRNGKey(0)
    kx, kp = jax.random.split(key)

    # ResidualBlock(in_channels=4, out_channels=8, stride=1) -> shortcut = 1x1 conv + BN
    N, Cin, H, W = 2, 4, 16, 16
    Cout = 8
    x = jax.random.normal(kx, (N, Cin, H, W), jnp.float32)
    params = make_params(kp, Cin, Cout)

    out = residual_block(x, params)
    out = jax.block_until_ready(out)

    ref = reference(x, params)
    assert out.shape == (N, Cout, H, W)
    assert jnp.allclose(out, ref, rtol=1e-4, atol=1e-4), \
        f"max abs err = {jnp.max(jnp.abs(out - ref))}"

    print("KERNEL_OK")
</pallas_src>

<mosaic_0001>
module attributes {stable_mosaic.version = 11 : i64} {
  func.func @_epilogue_kernel(%arg0: i32, %arg1: memref<1x8x512xf32, #tpu.memory_space<vmem>>, %arg2: memref<1x8x512xf32, #tpu.memory_space<vmem>>, %arg3: memref<1x16x2xf32, #tpu.memory_space<vmem>>, %arg4: memref<1x8x2xf32, #tpu.memory_space<vmem>>, %arg5: memref<8x2xf32, #tpu.memory_space<vmem>>, %arg6: memref<8x2xf32, #tpu.memory_space<vmem>>, %arg7: memref<2x8x256xf32, #tpu.memory_space<vmem>>) attributes {dimension_semantics = [#tpu.dimension_semantics<parallel>], iteration_bounds = array<i64: 1>, scalar_prefetch = 0 : i64, scratch_operands = 0 : i64, tpu.core_type = #tpu.core_type<tc>, window_params = [{transform_indices = @transform_0, window_bounds = array<i64: 1, 8, 512>}, {transform_indices = @transform_1, window_bounds = array<i64: 1, 8, 512>}, {pipeline_mode = #tpu.pipeline_mode<synchronous>, transform_indices = @transform_2, window_bounds = array<i64: 1, 16, 2>}, {pipeline_mode = #tpu.pipeline_mode<synchronous>, transform_indices = @transform_3, window_bounds = array<i64: 1, 8, 2>}, {pipeline_mode = #tpu.pipeline_mode<synchronous>, transform_indices = @transform_4, window_bounds = array<i64: 8, 2>}, {pipeline_mode = #tpu.pipeline_mode<synchronous>, transform_indices = @transform_5, window_bounds = array<i64: 8, 2>}, {transform_indices = @transform_6, window_bounds = array<i64: 2, 8, 256>}]} {
    %c0 = arith.constant 0 : index
    %c0_0 = arith.constant 0 : index
    %c0_1 = arith.constant 0 : index
    %0 = vector.load %arg4[%c0, %c0_0, %c0_1] : memref<1x8x2xf32, #tpu.memory_space<vmem>>, vector<1x8x2xf32>
    %cst = arith.constant dense<0.000000e+00> : vector<8x2xf32>
    %1 = vector.multi_reduction <add>, %0, %cst [0] : vector<1x8x2xf32> to vector<8x2xf32>
    %c0_2 = arith.constant 0 : index
    %c0_3 = arith.constant 0 : index
    %c0_4 = arith.constant 0 : index
    %2 = vector.load %arg3[%c0_2, %c0_3, %c0_4] : memref<1x16x2xf32, #tpu.memory_space<vmem>>, vector<1x16x2xf32>
    %cst_5 = arith.constant dense<0.000000e+00> : vector<16x2xf32>
    %3 = vector.multi_reduction <add>, %2, %cst_5 [0] : vector<1x16x2xf32> to vector<16x2xf32>
    %c0_6 = arith.constant 0 : index
    %c0_7 = arith.constant 0 : index
    %4 = vector.load %arg5[%c0_6, %c0_7] : memref<8x2xf32, #tpu.memory_space<vmem>>, vector<8x2xf32>
    %5 = vector.extract_strided_slice %1 {offsets = [0, 0], sizes = [8, 1], strides = [1, 1]} : vector<8x2xf32> to vector<8x1xf32>
    %cst_8 = arith.constant 5.120000e+02 : f32
    %6 = vector.broadcast %cst_8 : f32 to vector<8x1xf32>
    %7 = arith.divf %5, %6 : vector<8x1xf32>
    %8 = vector.extract_strided_slice %1 {offsets = [0, 1], sizes = [8, 1], strides = [1, 1]} : vector<8x2xf32> to vector<8x1xf32>
    %cst_9 = arith.constant 5.120000e+02 : f32
    %9 = vector.broadcast %cst_9 : f32 to vector<8x1xf32>
    %10 = arith.divf %8, %9 : vector<8x1xf32>
    %11 = arith.mulf %7, %7 : vector<8x1xf32>
    %12 = arith.subf %10, %11 : vector<8x1xf32>
    %cst_10 = arith.constant 0.000000e+00 : f32
    %13 = vector.broadcast %cst_10 : f32 to vector<8x1xf32>
    %14 = arith.maximumf %12, %13 : vector<8x1xf32>
    %15 = vector.extract_strided_slice %4 {offsets = [0, 0], sizes = [8, 1], strides = [1, 1]} : vector<8x2xf32> to vector<8x1xf32>
    %cst_11 = arith.constant 9.99999974E-6 : f32
    %16 = vector.broadcast %cst_11 : f32 to vector<8x1xf32>
    %17 = arith.addf %14, %16 : vector<8x1xf32>
    %18 = math.rsqrt %17 : vector<8x1xf32>
    %19 = arith.mulf %15, %18 : vector<8x1xf32>
    %20 = vector.extract_strided_slice %4 {offsets = [0, 1], sizes = [8, 1], strides = [1, 1]} : vector<8x2xf32> to vector<8x1xf32>
    %21 = arith.mulf %7, %19 : vector<8x1xf32>
    %22 = arith.subf %20, %21 : vector<8x1xf32>
    %23 = vector.extract_strided_slice %3 {offsets = [8, 0], sizes = [8, 2], strides = [1, 1]} : vector<16x2xf32> to vector<8x2xf32>
    %c0_12 = arith.constant 0 : index
    %c0_13 = arith.constant 0 : index
    %24 = vector.load %arg6[%c0_12, %c0_13] : memref<8x2xf32, #tpu.memory_space<vmem>>, vector<8x2xf32>
    %25 = vector.extract_strided_slice %23 {offsets = [0, 0], sizes = [8, 1], strides = [1, 1]} : vector<8x2xf32> to vector<8x1xf32>
    %cst_14 = arith.constant 5.120000e+02 : f32
    %26 = vector.broadcast %cst_14 : f32 to vector<8x1xf32>
    %27 = arith.divf %25, %26 : vector<8x1xf32>
    %28 = vector.extract_strided_slice %23 {offsets = [0, 1], sizes = [8, 1], strides = [1, 1]} : vector<8x2xf32> to vector<8x1xf32>
    %cst_15 = arith.constant 5.120000e+02 : f32
    %29 = vector.broadcast %cst_15 : f32 to vector<8x1xf32>
    %30 = arith.divf %28, %29 : vector<8x1xf32>
    %31 = arith.mulf %27, %27 : vector<8x1xf32>
    %32 = arith.subf %30, %31 : vector<8x1xf32>
    %cst_16 = arith.constant 0.000000e+00 : f32
    %33 = vector.broadcast %cst_16 : f32 to vector<8x1xf32>
    %34 = arith.maximumf %32, %33 : vector<8x1xf32>
    %35 = vector.extract_strided_slice %24 {offsets = [0, 0], sizes = [8, 1], strides = [1, 1]} : vector<8x2xf32> to vector<8x1xf32>
    %cst_17 = arith.constant 9.99999974E-6 : f32
    %36 = vector.broadcast %cst_17 : f32 to vector<8x1xf32>
    %37 = arith.addf %34, %36 : vector<8x1xf32>
    %38 = math.rsqrt %37 : vector<8x1xf32>
    %39 = arith.mulf %35, %38 : vector<8x1xf32>
    %40 = vector.extract_strided_slice %24 {offsets = [0, 1], sizes = [8, 1], strides = [1, 1]} : vector<8x2xf32> to vector<8x1xf32>
    %41 = arith.mulf %27, %39 : vector<8x1xf32>
    %42 = arith.subf %40, %41 : vector<8x1xf32>
    %c0_18 = arith.constant 0 : index
    %c0_19 = arith.constant 0 : index
    %c0_20 = arith.constant 0 : index
    %43 = vector.load %arg1[%c0_18, %c0_19, %c0_20] : memref<1x8x512xf32, #tpu.memory_space<vmem>>, vector<1x8x512xf32>
    %44 = vector.shape_cast %43 : vector<1x8x512xf32> to vector<8x512xf32>
    %45 = vector.broadcast %19 : vector<8x1xf32> to vector<8x512xf32>
    %46 = arith.mulf %44, %45 : vector<8x512xf32>
    %47 = vector.broadcast %22 : vector<8x1xf32> to vector<8x512xf32>
    %48 = arith.addf %46, %47 : vector<8x512xf32>
    %c0_21 = arith.constant 0 : index
    %c0_22 = arith.constant 0 : index
    %c0_23 = arith.constant 0 : index
    %49 = vector.load %arg2[%c0_21, %c0_22, %c0_23] : memref<1x8x512xf32, #tpu.memory_space<vmem>>, vector<1x8x512xf32>
    %50 = vector.shape_cast %49 : vector<1x8x512xf32> to vector<8x512xf32>
    %51 = vector.broadcast %39 : vector<8x1xf32> to vector<8x512xf32>
    %52 = arith.mulf %50, %51 : vector<8x512xf32>
    %53 = vector.broadcast %42 : vector<8x1xf32> to vector<8x512xf32>
    %54 = arith.addf %52, %53 : vector<8x512xf32>
    %55 = arith.addf %48, %54 : vector<8x512xf32>
    %cst_24 = arith.constant 0.000000e+00 : f32
    %56 = vector.broadcast %cst_24 : f32 to vector<8x512xf32>
    %57 = arith.maximumf %55, %56 : vector<8x512xf32>
    %58 = vector.extract_strided_slice %57 {offsets = [0, 0], sizes = [8, 256], strides = [1, 1]} : vector<8x512xf32> to vector<8x256xf32>
    %c0_25 = arith.constant 0 : index
    %c0_26 = arith.constant 0 : index
    %c0_27 = arith.constant 0 : index
    %59 = vector.load %arg7[%c0_25, %c0_26, %c0_27] : memref<2x8x256xf32, #tpu.memory_space<vmem>>, vector<1x8x256xf32>
    %60 = vector.shape_cast %59 : vector<1x8x256xf32> to vector<8x256xf32>
    %61 = vector.shape_cast %58 : vector<8x256xf32> to vector<1x8x256xf32>
    tpu.vector_store %arg7[%c0_25, %c0_26, %c0_27], %61 {strides = array<i32>} : memref<2x8x256xf32, #tpu.memory_space<vmem>>, vector<1x8x256xf32>,
    %62 = vector.extract_strided_slice %57 {offsets = [0, 256], sizes = [8, 256], strides = [1, 1]} : vector<8x512xf32> to vector<8x256xf32>
    %c1 = arith.constant 1 : index
    %c0_28 = arith.constant 0 : index
    %c0_29 = arith.constant 0 : index
    %63 = vector.load %arg7[%c1, %c0_28, %c0_29] : memref<2x8x256xf32, #tpu.memory_space<vmem>>, vector<1x8x256xf32>
    %64 = vector.shape_cast %63 : vector<1x8x256xf32> to vector<8x256xf32>
    %65 = vector.shape_cast %62 : vector<8x256xf32> to vector<1x8x256xf32>
    tpu.vector_store %arg7[%c1, %c0_28, %c0_29], %65 {strides = array<i32>} : memref<2x8x256xf32, #tpu.memory_space<vmem>>, vector<1x8x256xf32>,
    return
  }
  func.func @transform_0(%arg0: i32) -> (i32, i32, i32) {
    %c0_i32 = arith.constant 0 : i32
    %c0_i32_0 = arith.constant 0 : i32
    %c0_i32_1 = arith.constant 0 : i32
    return %arg0, %c0_i32, %c0_i32_0 : i32, i32, i32
  }
  func.func @transform_1(%arg0: i32) -> (i32, i32, i32) {
    %c0_i32 = arith.constant 0 : i32
    %c0_i32_0 = arith.constant 0 : i32
    %c0_i32_1 = arith.constant 0 : i32
    return %arg0, %c0_i32, %c0_i32_0 : i32, i32, i32
  }
  func.func @transform_2(%arg0: i32) -> (i32, i32, i32) {
    %c0_i32 = arith.constant 0 : i32
    %c0_i32_0 = arith.constant 0 : i32
    %c0_i32_1 = arith.constant 0 : i32
    %c0_i32_2 = arith.constant 0 : i32
    return %c0_i32, %c0_i32_0, %c0_i32_1 : i32, i32, i32
  }
  func.func @transform_3(%arg0: i32) -> (i32, i32, i32) {
    %c0_i32 = arith.constant 0 : i32
    %c0_i32_0 = arith.constant 0 : i32
    %c0_i32_1 = arith.constant 0 : i32
    %c0_i32_2 = arith.constant 0 : i32
    return %c0_i32, %c0_i32_0, %c0_i32_1 : i32, i32, i32
  }
  func.func @transform_4(%arg0: i32) -> (i32, i32) {
    %c0_i32 = arith.constant 0 : i32
    %c0_i32_0 = arith.constant 0 : i32
    %c0_i32_1 = arith.constant 0 : i32
    return %c0_i32, %c0_i32_0 : i32, i32
  }
  func.func @transform_5(%arg0: i32) -> (i32, i32) {
    %c0_i32 = arith.constant 0 : i32
    %c0_i32_0 = arith.constant 0 : i32
    %c0_i32_1 = arith.constant 0 : i32
    return %c0_i32, %c0_i32_0 : i32, i32
  }
  func.func @transform_6(%arg0: i32) -> (i32, i32, i32) {
    %c0_i32 = arith.constant 0 : i32
    %c0_i32_0 = arith.constant 0 : i32
    %c0_i32_1 = arith.constant 0 : i32
    return %arg0, %c0_i32, %c0_i32_0 : i32, i32, i32
  }
}

module attributes {stable_mosaic.version = 11 : i64} {
  func.func @_conv1_shortcut_kernel(%arg0: i32, %arg1: memref<2x4x256xf32, #tpu.memory_space<vmem>>, %arg2: memref<16x72xf32, #tpu.memory_space<vmem>>, %arg3: memref<9x512xf32, #tpu.memory_space<vmem>>, %arg4: memref<1x8x512xf32, #tpu.memory_space<vmem>>, %arg5: memref<1x8x512xf32, #tpu.memory_space<vmem>>, %arg6: memref<1x16x2xf32, #tpu.memory_space<vmem>>, %arg7: memref<8x546xf32, #tpu.memory_space<vmem>>, %arg8: memref<72x512xf32, #tpu.memory_space<vmem>>) attributes {dimension_semantics = [#tpu.dimension_semantics<parallel>], iteration_bounds = array<i64: 1>, scalar_prefetch = 0 : i64, scratch_operands = 2 : i64, tpu.core_type = #tpu.core_type<tc>, window_params = [{transform_indices = @transform_0, window_bounds = array<i64: 2, 4, 256>}, {pipeline_mode = #tpu.pipeline_mode<synchronous>, transform_indices = @transform_1, window_bounds = array<i64: 16, 72>}, {pipeline_mode = #tpu.pipeline_mode<synchronous>, transform_indices = @transform_2, window_bounds = array<i64: 9, 512>}, {transform_indices = @transform_3, window_bounds = array<i64: 1, 8, 512>}, {transform_indices = @transform_4, window_bounds = array<i64: 1, 8, 512>}, {transform_indices = @transform_5, window_bounds = array<i64: 1, 16, 2>}]} {
    %cst = arith.constant 0.000000e+00 : f32
    %0 = vector.broadcast %cst : f32 to vector<8x17xf32>
    %c0 = arith.constant 0 : index
    %c0_0 = arith.constant 0 : index
    %1 = vector.load %arg7[%c0, %c0_0] : memref<8x546xf32, #tpu.memory_space<vmem>>, vector<8x17xf32>
    tpu.vector_store %arg7[%c0, %c0_0], %0 {strides = array<i32>} : memref<8x546xf32, #tpu.memory_space<vmem>>, vector<8x17xf32>,
    %cst_1 = arith.constant 0.000000e+00 : f32
    %2 = vector.broadcast %cst_1 : f32 to vector<8x17xf32>
    %c0_2 = arith.constant 0 : index
    %c529 = arith.constant 529 : index
    %3 = vector.load %arg7[%c0_2, %c529] : memref<8x546xf32, #tpu.memory_space<vmem>>, vector<8x17xf32>
    tpu.vector_store %arg7[%c0_2, %c529], %2 {strides = array<i32>} : memref<8x546xf32, #tpu.memory_space<vmem>>, vector<8x17xf32>,
    %cst_3 = arith.constant 0.000000e+00 : f32
    %4 = vector.broadcast %cst_3 : f32 to vector<4x512xf32>
    %c4 = arith.constant 4 : index
    %c17 = arith.constant 17 : index
    %5 = vector.load %arg7[%c4, %c17] : memref<8x546xf32, #tpu.memory_space<vmem>>, vector<4x512xf32>
    tpu.vector_store %arg7[%c4, %c17], %4 {strides = array<i32>} : memref<8x546xf32, #tpu.memory_space<vmem>>, vector<4x512xf32>,
    %c0_4 = arith.constant 0 : index
    %c0_5 = arith.constant 0 : index
    %c0_6 = arith.constant 0 : index
    %6 = vector.load %arg1[%c0_4, %c0_5, %c0_6] : memref<2x4x256xf32, #tpu.memory_space<vmem>>, vector<1x4x256xf32>
    %7 = vector.shape_cast %6 : vector<1x4x256xf32> to vector<4x256xf32>
    %c0_7 = arith.constant 0 : index
    %c17_8 = arith.constant 17 : index
    %8 = vector.load %arg7[%c0_7, %c17_8] : memref<8x546xf32, #tpu.memory_space<vmem>>, vector<4x256xf32>
    tpu.vector_store %arg7[%c0_7, %c17_8], %7 {strides = array<i32>} : memref<8x546xf32, #tpu.memory_space<vmem>>, vector<4x256xf32>,
    %c1 = arith.constant 1 : index
    %c0_9 = arith.constant 0 : index
    %c0_10 = arith.constant 0 : index
    %9 = vector.load %arg1[%c1, %c0_9, %c0_10] : memref<2x4x256xf32, #tpu.memory_space<vmem>>, vector<1x4x256xf32>
    %10 = vector.shape_cast %9 : vector<1x4x256xf32> to vector<4x256xf32>
    %c0_11 = arith.constant 0 : index
    %c273 = arith.constant 273 : index
    %11 = vector.load %arg7[%c0_11, %c273] : memref<8x546xf32, #tpu.memory_space<vmem>>, vector<4x256xf32>
    tpu.vector_store %arg7[%c0_11, %c273], %10 {strides = array<i32>} : memref<8x546xf32, #tpu.memory_space<vmem>>, vector<4x256xf32>,
    %c0_12 = arith.constant 0 : index
    %c0_13 = arith.constant 0 : index
    %12 = vector.load %arg7[%c0_12, %c0_13] : memref<8x546xf32, #tpu.memory_space<vmem>>, vector<8x512xf32>
    %c0_14 = arith.constant 0 : index
    %c0_15 = arith.constant 0 : index
    %13 = vector.load %arg3[%c0_14, %c0_15] : memref<9x512xf32, #tpu.memory_space<vmem>>, vector<1x512xf32>
    %14 = vector.broadcast %13 : vector<1x512xf32> to vector<8x512xf32>
    %15 = arith.mulf %12, %14 : vector<8x512xf32>
    %c0_16 = arith.constant 0 : index
    %c0_17 = arith.constant 0 : index
    %16 = vector.load %arg8[%c0_16, %c0_17] : memref<72x512xf32, #tpu.memory_space<vmem>>, vector<8x512xf32>
    tpu.vector_store %arg8[%c0_16, %c0_17], %15 {strides = array<i32>} : memref<72x512xf32, #tpu.memory_space<vmem>>, vector<8x512xf32>,
    %c0_18 = arith.constant 0 : index
    %c1_19 = arith.constant 1 : index
    %17 = vector.load %arg7[%c0_18, %c1_19] : memref<8x546xf32, #tpu.memory_space<vmem>>, vector<8x512xf32>
    %c1_20 = arith.constant 1 : index
    %c0_21 = arith.constant 0 : index
    %18 = vector.load %arg3[%c1_20, %c0_21] : memref<9x512xf32, #tpu.memory_space<vmem>>, vector<1x512xf32>
    %19 = vector.broadcast %18 : vector<1x512xf32> to vector<8x512xf32>
    %20 = arith.mulf %17, %19 : vector<8x512xf32>
    %c8 = arith.constant 8 : index
    %c0_22 = arith.constant 0 : index
    %21 = vector.load %arg8[%c8, %c0_22] : memref<72x512xf32, #tpu.memory_space<vmem>>, vector<8x512xf32>
    tpu.vector_store %arg8[%c8, %c0_22], %20 {strides = array<i32>} : memref<72x512xf32, #tpu.memory_space<vmem>>, vector<8x512xf32>,
    %c0_23 = arith.constant 0 : index
    %c2 = arith.constant 2 : index
    %22 = vector.load %arg7[%c0_23, %c2] : memref<8x546xf32, #tpu.memory_space<vmem>>, vector<8x512xf32>
    %c2_24 = arith.constant 2 : index
    %c0_25 = arith.constant 0 : index
    %23 = vector.load %arg3[%c2_24, %c0_25] : memref<9x512xf32, #tpu.memory_space<vmem>>, vector<1x512xf32>
    %24 = vector.broadcast %23 : vector<1x512xf32> to vector<8x512xf32>
    %25 = arith.mulf %22, %24 : vector<8x512xf32>
    %c16 = arith.constant 16 : index
    %c0_26 = arith.constant 0 : index
    %26 = vector.load %arg8[%c16, %c0_26] : memref<72x512xf32, #tpu.memory_space<vmem>>, vector<8x512xf32>
    tpu.vector_store %arg8[%c16, %c0_26], %25 {strides = array<i32>} : memref<72x512xf32, #tpu.memory_space<vmem>>, vector<8x512xf32>,
    %c0_27 = arith.constant 0 : index
    %c16_28 = arith.constant 16 : index
    %27 = vector.load %arg7[%c0_27, %c16_28] : memref<8x546xf32, #tpu.memory_space<vmem>>, vector<8x512xf32>
    %c3 = arith.constant 3 : index
    %c0_29 = arith.constant 0 : index
    %28 = vector.load %arg3[%c3, %c0_29] : memref<9x512xf32, #tpu.memory_space<vmem>>, vector<1x512xf32>
    %29 = vector.broadcast %28 : vector<1x512xf32> to vector<8x512xf32>
    %30 = arith.mulf %27, %29 : vector<8x512xf32>
    %c24 = arith.constant 24 : index
    %c0_30 = arith.constant 0 : index
    %31 = vector.load %arg8[%c24, %c0_30] : memref<72x512xf32, #tpu.memory_space<vmem>>, vector<8x512xf32>
    tpu.vector_store %arg8[%c24, %c0_30], %30 {strides = array<i32>} : memref<72x512xf32, #tpu.memory_space<vmem>>, vector<8x512xf32>,
    %c0_31 = arith.constant 0 : index
    %c17_32 = arith.constant 17 : index
    %32 = vector.load %arg7[%c0_31, %c17_32] : memref<8x546xf32, #tpu.memory_space<vmem>>, vector<8x512xf32>
    %c4_33 = arith.constant 4 : index
    %c0_34 = arith.constant 0 : index
    %33 = vector.load %arg3[%c4_33, %c0_34] : memref<9x512xf32, #tpu.memory_space<vmem>>, vector<1x512xf32>
    %34 = vector.broadcast %33 : vector<1x512xf32> to vector<8x512xf32>
    %35 = arith.mulf %32, %34 : vector<8x512xf32>
    %c32 = arith.constant 32 : index
    %c0_35 = arith.constant 0 : index
    %36 = vector.load %arg8[%c32, %c0_35] : memref<72x512xf32, #tpu.memory_space<vmem>>, vector<8x512xf32>
    tpu.vector_store %arg8[%c32, %c0_35], %35 {strides = array<i32>} : memref<72x512xf32, #tpu.memory_space<vmem>>, vector<8x512xf32>,
    %c0_36 = arith.constant 0 : index
    %c18 = arith.constant 18 : index
    %37 = vector.load %arg7[%c0_36, %c18] : memref<8x546xf32, #tpu.memory_space<vmem>>, vector<8x512xf32>
    %c5 = arith.constant 5 : index
    %c0_37 = arith.constant 0 : index
    %38 = vector.load %arg3[%c5, %c0_37] : memref<9x512xf32, #tpu.memory_space<vmem>>, vector<1x512xf32>
    %39 = vector.broadcast %38 : vector<1x512xf32> to vector<8x512xf32>
    %40 = arith.mulf %37, %39 : vector<8x512xf32>
    %c40 = arith.constant 40 : index
    %c0_38 = arith.constant 0 : index
    %41 = vector.load %arg8[%c40, %c0_38] : memref<72x512xf32, #tpu.memory_space<vmem>>, vector<8x512xf32>
    tpu.vector_store %arg8[%c40, %c0_38], %40 {strides = array<i32>} : memref<72x512xf32, #tpu.memory_space<vmem>>, vector<8x512xf32>,
    %c0_39 = arith.constant 0 : index
    %c32_40 = arith.constant 32 : index
    %42 = vector.load %arg7[%c0_39, %c32_40] : memref<8x546xf32, #tpu.memory_space<vmem>>, vector<8x512xf32>
    %c6 = arith.constant 6 : index
    %c0_41 = arith.constant 0 : index
    %43 = vector.load %arg3[%c6, %c0_41] : memref<9x512xf32, #tpu.memory_space<vmem>>, vector<1x512xf32>
    %44 = vector.broadcast %43 : vector<1x512xf32> to vector<8x512xf32>
    %45 = arith.mulf %42, %44 : vector<8x512xf32>
    %c48 = arith.constant 48 : index
    %c0_42 = arith.constant 0 : index
    %46 = vector.load %arg8[%c48, %c0_42] : memref<72x512xf32, #tpu.memory_space<vmem>>, vector<8x512xf32>
    tpu.vector_store %arg8[%c48, %c0_42], %45 {strides = array<i32>} : memref<72x512xf32, #tpu.memory_space<vmem>>, vector<8x512xf32>,
    %c0_43 = arith.constant 0 : index
    %c33 = arith.constant 33 : index
    %47 = vector.load %arg7[%c0_43, %c33] : memref<8x546xf32, #tpu.memory_space<vmem>>, vector<8x512xf32>
    %c7 = arith.constant 7 : index
    %c0_44 = arith.constant 0 : index
    %48 = vector.load %arg3[%c7, %c0_44] : memref<9x512xf32, #tpu.memory_space<vmem>>, vector<1x512xf32>
    %49 = vector.broadcast %48 : vector<1x512xf32> to vector<8x512xf32>
    %50 = arith.mulf %47, %49 : vector<8x512xf32>
    %c56 = arith.constant 56 : index
    %c0_45 = arith.constant 0 : index
    %51 = vector.load %arg8[%c56, %c0_45] : memref<72x512xf32, #tpu.memory_space<vmem>>, vector<8x512xf32>
    tpu.vector_store %arg8[%c56, %c0_45], %50 {strides = array<i32>} : memref<72x512xf32, #tpu.memory_space<vmem>>, vector<8x512xf32>,
    %c0_46 = arith.constant 0 : index
    %c34 = arith.constant 34 : index
    %52 = vector.load %arg7[%c0_46, %c34] : memref<8x546xf32, #tpu.memory_space<vmem>>, vector<8x512xf32>
    %c8_47 = arith.constant 8 : index
    %c0_48 = arith.constant 0 : index
    %53 = vector.load %arg3[%c8_47, %c0_48] : memref<9x512xf32, #tpu.memory_space<vmem>>, vector<1x512xf32>
    %54 = vector.broadcast %53 : vector<1x512xf32> to vector<8x512xf32>
    %55 = arith.mulf %52, %54 : vector<8x512xf32>
    %c64 = arith.constant 64 : index
    %c0_49 = arith.constant 0 : index
    %56 = vector.load %arg8[%c64, %c0_49] : memref<72x512xf32, #tpu.memory_space<vmem>>, vector<8x512xf32>
    tpu.vector_store %arg8[%c64, %c0_49], %55 {strides = array<i32>} : memref<72x512xf32, #tpu.memory_space<vmem>>, vector<8x512xf32>,
    %c0_50 = arith.constant 0 : index
    %c0_51 = arith.constant 0 : index
    %57 = vector.load %arg2[%c0_50, %c0_51] : memref<16x72xf32, #tpu.memory_space<vmem>>, vector<16x72xf32>
    %c0_52 = arith.constant 0 : index
    %c0_53 = arith.constant 0 : index
    %58 = vector.load %arg8[%c0_52, %c0_53] : memref<72x512xf32, #tpu.memory_space<vmem>>, vector<72x512xf32>
    %cst_54 = arith.constant dense<0.000000e+00> : vector<16x512xf32>
    %59 = tpu.matmul %57, %58, %cst_54 {dimension_numbers = #tpu.dot_dimension_numbers<[1], [0], [0], [1], [0, 0, 1, 1], [], []>} : vector<16x72xf32>, vector<72x512xf32>, vector<16x512xf32> -> vector<16x512xf32>
    %60 = vector.extract_strided_slice %59 {offsets = [0, 0], sizes = [8, 512], strides = [1, 1]} : vector<16x512xf32> to vector<8x512xf32>
    %c0_55 = arith.constant 0 : index
    %c0_56 = arith.constant 0 : index
    %c0_57 = arith.constant 0 : index
    %61 = vector.load %arg4[%c0_55, %c0_56, %c0_57] : memref<1x8x512xf32, #tpu.memory_space<vmem>>, vector<1x8x512xf32>
    %62 = vector.shape_cast %61 : vector<1x8x512xf32> to vector<8x512xf32>
    %63 = vector.shape_cast %60 : vector<8x512xf32> to vector<1x8x512xf32>
    tpu.vector_store %arg4[%c0_55, %c0_56, %c0_57], %63 {strides = array<i32>} : memref<1x8x512xf32, #tpu.memory_space<vmem>>, vector<1x8x512xf32>,
    %64 = vector.extract_strided_slice %59 {offsets = [8, 0], sizes = [8, 512], strides = [1, 1]} : vector<16x512xf32> to vector<8x512xf32>
    %c0_58 = arith.constant 0 : index
    %c0_59 = arith.constant 0 : index
    %c0_60 = arith.constant 0 : index
    %65 = vector.load %arg5[%c0_58, %c0_59, %c0_60] : memref<1x8x512xf32, #tpu.memory_space<vmem>>, vector<1x8x512xf32>
    %66 = vector.shape_cast %65 : vector<1x8x512xf32> to vector<8x512xf32>
    %67 = vector.shape_cast %64 : vector<8x512xf32> to vector<1x8x512xf32>
    tpu.vector_store %arg5[%c0_58, %c0_59, %c0_60], %67 {strides = array<i32>} : memref<1x8x512xf32, #tpu.memory_space<vmem>>, vector<1x8x512xf32>,
    %cst_61 = arith.constant dense<0.000000e+00> : vector<16xf32>
    %68 = vector.multi_reduction <add>, %59, %cst_61 [1] : vector<16x512xf32> to vector<16xf32>
    %69 = vector.shape_cast %68 : vector<16xf32> to vector<16x1xf32>
    %70 = arith.mulf %59, %59 : vector<16x512xf32>
    %cst_62 = arith.constant dense<0.000000e+00> : vector<16xf32>
    %71 = vector.multi_reduction <add>, %70, %cst_62 [1] : vector<16x512xf32> to vector<16xf32>
    %72 = vector.shape_cast %71 : vector<16xf32> to vector<16x1xf32>
    %73 = tpu.concatenate %69, %72 in 1 : vector<16x1xf32>, vector<16x1xf32> -> vector<16x2xf32>
    %c0_63 = arith.constant 0 : index
    %c0_64 = arith.constant 0 : index
    %c0_65 = arith.constant 0 : index
    %74 = vector.load %arg6[%c0_63, %c0_64, %c0_65] : memref<1x16x2xf32, #tpu.memory_space<vmem>>, vector<1x16x2xf32>
    %75 = vector.shape_cast %74 : vector<1x16x2xf32> to vector<16x2xf32>
    %76 = vector.shape_cast %73 : vector<16x2xf32> to vector<1x16x2xf32>
    tpu.vector_store %arg6[%c0_63, %c0_64, %c0_65], %76 {strides = array<i32>} : memref<1x16x2xf32, #tpu.memory_space<vmem>>, vector<1x16x2xf32>,
    return
  }
  func.func @transform_0(%arg0: i32) -> (i32, i32, i32) {
    %c0_i32 = arith.constant 0 : i32
    %c0_i32_0 = arith.constant 0 : i32
    %c0_i32_1 = arith.constant 0 : i32
    return %arg0, %c0_i32, %c0_i32_0 : i32, i32, i32
  }
  func.func @transform_1(%arg0: i32) -> (i32, i32) {
    %c0_i32 = arith.constant 0 : i32
    %c0_i32_0 = arith.constant 0 : i32
    %c0_i32_1 = arith.constant 0 : i32
    return %c0_i32, %c0_i32_0 : i32, i32
  }
  func.func @transform_2(%arg0: i32) -> (i32, i32) {
    %c0_i32 = arith.constant 0 : i32
    %c0_i32_0 = arith.constant 0 : i32
    %c0_i32_1 = arith.constant 0 : i32
    return %c0_i32, %c0_i32_0 : i32, i32
  }
  func.func @transform_3(%arg0: i32) -> (i32, i32, i32) {
    %c0_i32 = arith.constant 0 : i32
    %c0_i32_0 = arith.constant 0 : i32
    %c0_i32_1 = arith.constant 0 : i32
    return %arg0, %c0_i32, %c0_i32_0 : i32, i32, i32
  }
  func.func @transform_4(%arg0: i32) -> (i32, i32, i32) {
    %c0_i32 = arith.constant 0 : i32
    %c0_i32_0 = arith.constant 0 : i32
    %c0_i32_1 = arith.constant 0 : i32
    return %arg0, %c0_i32, %c0_i32_0 : i32, i32, i32
  }
  func.func @transform_5(%arg0: i32) -> (i32, i32, i32) {
    %c0_i32 = arith.constant 0 : i32
    %c0_i32_0 = arith.constant 0 : i32
    %c0_i32_1 = arith.constant 0 : i32
    return %arg0, %c0_i32, %c0_i32_0 : i32, i32, i32
  }
}

module attributes {stable_mosaic.version = 11 : i64} {
  func.func @_conv2_kernel(%arg0: i32, %arg1: memref<1x8x512xf32, #tpu.memory_space<vmem>>, %arg2: memref<8x72xf32, #tpu.memory_space<vmem>>, %arg3: memref<1x16x2xf32, #tpu.memory_space<vmem>>, %arg4: memref<8x2xf32, #tpu.memory_space<vmem>>, %arg5: memref<9x512xf32, #tpu.memory_space<vmem>>, %arg6: memref<1x8x512xf32, #tpu.memory_space<vmem>>, %arg7: memref<1x8x2xf32, #tpu.memory_space<vmem>>, %arg8: memref<8x546xf32, #tpu.memory_space<vmem>>, %arg9: memref<72x512xf32, #tpu.memory_space<vmem>>) attributes {dimension_semantics = [#tpu.dimension_semantics<parallel>], iteration_bounds = array<i64: 1>, scalar_prefetch = 0 : i64, scratch_operands = 2 : i64, tpu.core_type = #tpu.core_type<tc>, window_params = [{transform_indices = @transform_0, window_bounds = array<i64: 1, 8, 512>}, {pipeline_mode = #tpu.pipeline_mode<synchronous>, transform_indices = @transform_1, window_bounds = array<i64: 8, 72>}, {pipeline_mode = #tpu.pipeline_mode<synchronous>, transform_indices = @transform_2, window_bounds = array<i64: 1, 16, 2>}, {pipeline_mode = #tpu.pipeline_mode<synchronous>, transform_indices = @transform_3, window_bounds = array<i64: 8, 2>}, {pipeline_mode = #tpu.pipeline_mode<synchronous>, transform_indices = @transform_4, window_bounds = array<i64: 9, 512>}, {transform_indices = @transform_5, window_bounds = array<i64: 1, 8, 512>}, {transform_indices = @transform_6, window_bounds = array<i64: 1, 8, 2>}]} {
    %c0 = arith.constant 0 : index
    %c0_0 = arith.constant 0 : index
    %c0_1 = arith.constant 0 : index
    %0 = vector.load %arg3[%c0, %c0_0, %c0_1] : memref<1x16x2xf32, #tpu.memory_space<vmem>>, vector<1x16x2xf32>
    %cst = arith.constant dense<0.000000e+00> : vector<16x2xf32>
    %1 = vector.multi_reduction <add>, %0, %cst [0] : vector<1x16x2xf32> to vector<16x2xf32>
    %2 = vector.extract_strided_slice %1 {offsets = [0, 0], sizes = [8, 2], strides = [1, 1]} : vector<16x2xf32> to vector<8x2xf32>
    %c0_2 = arith.constant 0 : index
    %c0_3 = arith.constant 0 : index
    %3 = vector.load %arg4[%c0_2, %c0_3] : memref<8x2xf32, #tpu.memory_space<vmem>>, vector<8x2xf32>
    %4 = vector.extract_strided_slice %2 {offsets = [0, 0], sizes = [8, 1], strides = [1, 1]} : vector<8x2xf32> to vector<8x1xf32>
    %cst_4 = arith.constant 5.120000e+02 : f32
    %5 = vector.broadcast %cst_4 : f32 to vector<8x1xf32>
    %6 = arith.divf %4, %5 : vector<8x1xf32>
    %7 = vector.extract_strided_slice %2 {offsets = [0, 1], sizes = [8, 1], strides = [1, 1]} : vector<8x2xf32> to vector<8x1xf32>
    %cst_5 = arith.constant 5.120000e+02 : f32
    %8 = vector.broadcast %cst_5 : f32 to vector<8x1xf32>
    %9 = arith.divf %7, %8 : vector<8x1xf32>
    %10 = arith.mulf %6, %6 : vector<8x1xf32>
    %11 = arith.subf %9, %10 : vector<8x1xf32>
    %cst_6 = arith.constant 0.000000e+00 : f32
    %12 = vector.broadcast %cst_6 : f32 to vector<8x1xf32>
    %13 = arith.maximumf %11, %12 : vector<8x1xf32>
    %14 = vector.extract_strided_slice %3 {offsets = [0, 0], sizes = [8, 1], strides = [1, 1]} : vector<8x2xf32> to vector<8x1xf32>
    %cst_7 = arith.constant 9.99999974E-6 : f32
    %15 = vector.broadcast %cst_7 : f32 to vector<8x1xf32>
    %16 = arith.addf %13, %15 : vector<8x1xf32>
    %17 = math.rsqrt %16 : vector<8x1xf32>
    %18 = arith.mulf %14, %17 : vector<8x1xf32>
    %19 = vector.extract_strided_slice %3 {offsets = [0, 1], sizes = [8, 1], strides = [1, 1]} : vector<8x2xf32> to vector<8x1xf32>
    %20 = arith.mulf %6, %18 : vector<8x1xf32>
    %21 = arith.subf %19, %20 : vector<8x1xf32>
    %c0_8 = arith.constant 0 : index
    %c0_9 = arith.constant 0 : index
    %c0_10 = arith.constant 0 : index
    %22 = vector.load %arg1[%c0_8, %c0_9, %c0_10] : memref<1x8x512xf32, #tpu.memory_space<vmem>>, vector<1x8x512xf32>
    %23 = vector.shape_cast %22 : vector<1x8x512xf32> to vector<8x512xf32>
    %24 = vector.broadcast %18 : vector<8x1xf32> to vector<8x512xf32>
    %25 = arith.mulf %23, %24 : vector<8x512xf32>
    %26 = vector.broadcast %21 : vector<8x1xf32> to vector<8x512xf32>
    %27 = arith.addf %25, %26 : vector<8x512xf32>
    %cst_11 = arith.constant 0.000000e+00 : f32
    %28 = vector.broadcast %cst_11 : f32 to vector<8x512xf32>
    %29 = arith.maximumf %27, %28 : vector<8x512xf32>
    %cst_12 = arith.constant 0.000000e+00 : f32
    %30 = vector.broadcast %cst_12 : f32 to vector<8x17xf32>
    %c0_13 = arith.constant 0 : index
    %c0_14 = arith.constant 0 : index
    %31 = vector.load %arg8[%c0_13, %c0_14] : memref<8x546xf32, #tpu.memory_space<vmem>>, vector<8x17xf32>
    tpu.vector_store %arg8[%c0_13, %c0_14], %30 {strides = array<i32>} : memref<8x546xf32, #tpu.memory_space<vmem>>, vector<8x17xf32>,
    %cst_15 = arith.constant 0.000000e+00 : f32
    %32 = vector.broadcast %cst_15 : f32 to vector<8x17xf32>
    %c0_16 = arith.constant 0 : index
    %c529 = arith.constant 529 : index
    %33 = vector.load %arg8[%c0_16, %c529] : memref<8x546xf32, #tpu.memory_space<vmem>>, vector<8x17xf32>
    tpu.vector_store %arg8[%c0_16, %c529], %32 {strides = array<i32>} : memref<8x546xf32, #tpu.memory_space<vmem>>, vector<8x17xf32>,
    %c0_17 = arith.constant 0 : index
    %c17 = arith.constant 17 : index
    %34 = vector.load %arg8[%c0_17, %c17] : memref<8x546xf32, #tpu.memory_space<vmem>>, vector<8x512xf32>
    tpu.vector_store %arg8[%c0_17, %c17], %29 {strides = array<i32>} : memref<8x546xf32, #tpu.memory_space<vmem>>, vector<8x512xf32>,
    %c0_18 = arith.constant 0 : index
    %c0_19 = arith.constant 0 : index
    %35 = vector.load %arg8[%c0_18, %c0_19] : memref<8x546xf32, #tpu.memory_space<vmem>>, vector<8x512xf32>
    %c0_20 = arith.constant 0 : index
    %c0_21 = arith.constant 0 : index
    %36 = vector.load %arg5[%c0_20, %c0_21] : memref<9x512xf32, #tpu.memory_space<vmem>>, vector<1x512xf32>
    %37 = vector.broadcast %36 : vector<1x512xf32> to vector<8x512xf32>
    %38 = arith.mulf %35, %37 : vector<8x512xf32>
    %c0_22 = arith.constant 0 : index
    %c0_23 = arith.constant 0 : index
    %39 = vector.load %arg9[%c0_22, %c0_23] : memref<72x512xf32, #tpu.memory_space<vmem>>, vector<8x512xf32>
    tpu.vector_store %arg9[%c0_22, %c0_23], %38 {strides = array<i32>} : memref<72x512xf32, #tpu.memory_space<vmem>>, vector<8x512xf32>,
    %c0_24 = arith.constant 0 : index
    %c1 = arith.constant 1 : index
    %40 = vector.load %arg8[%c0_24, %c1] : memref<8x546xf32, #tpu.memory_space<vmem>>, vector<8x512xf32>
    %c1_25 = arith.constant 1 : index
    %c0_26 = arith.constant 0 : index
    %41 = vector.load %arg5[%c1_25, %c0_26] : memref<9x512xf32, #tpu.memory_space<vmem>>, vector<1x512xf32>
    %42 = vector.broadcast %41 : vector<1x512xf32> to vector<8x512xf32>
    %43 = arith.mulf %40, %42 : vector<8x512xf32>
    %c8 = arith.constant 8 : index
    %c0_27 = arith.constant 0 : index
    %44 = vector.load %arg9[%c8, %c0_27] : memref<72x512xf32, #tpu.memory_space<vmem>>, vector<8x512xf32>
    tpu.vector_store %arg9[%c8, %c0_27], %43 {strides = array<i32>} : memref<72x512xf32, #tpu.memory_space<vmem>>, vector<8x512xf32>,
    %c0_28 = arith.constant 0 : index
    %c2 = arith.constant 2 : index
    %45 = vector.load %arg8[%c0_28, %c2] : memref<8x546xf32, #tpu.memory_space<vmem>>, vector<8x512xf32>
    %c2_29 = arith.constant 2 : index
    %c0_30 = arith.constant 0 : index
    %46 = vector.load %arg5[%c2_29, %c0_30] : memref<9x512xf32, #tpu.memory_space<vmem>>, vector<1x512xf32>
    %47 = vector.broadcast %46 : vector<1x512xf32> to vector<8x512xf32>
    %48 = arith.mulf %45, %47 : vector<8x512xf32>
    %c16 = arith.constant 16 : index
    %c0_31 = arith.constant 0 : index
    %49 = vector.load %arg9[%c16, %c0_31] : memref<72x512xf32, #tpu.memory_space<vmem>>, vector<8x512xf32>
    tpu.vector_store %arg9[%c16, %c0_31], %48 {strides = array<i32>} : memref<72x512xf32, #tpu.memory_space<vmem>>, vector<8x512xf32>,
    %c0_32 = arith.constant 0 : index
    %c16_33 = arith.constant 16 : index
    %50 = vector.load %arg8[%c0_32, %c16_33] : memref<8x546xf32, #tpu.memory_space<vmem>>, vector<8x512xf32>
    %c3 = arith.constant 3 : index
    %c0_34 = arith.constant 0 : index
    %51 = vector.load %arg5[%c3, %c0_34] : memref<9x512xf32, #tpu.memory_space<vmem>>, vector<1x512xf32>
    %52 = vector.broadcast %51 : vector<1x512xf32> to vector<8x512xf32>
    %53 = arith.mulf %50, %52 : vector<8x512xf32>
    %c24 = arith.constant 24 : index
    %c0_35 = arith.constant 0 : index
    %54 = vector.load %arg9[%c24, %c0_35] : memref<72x512xf32, #tpu.memory_space<vmem>>, vector<8x512xf32>
    tpu.vector_store %arg9[%c24, %c0_35], %53 {strides = array<i32>} : memref<72x512xf32, #tpu.memory_space<vmem>>, vector<8x512xf32>,
    %c0_36 = arith.constant 0 : index
    %c17_37 = arith.constant 17 : index
    %55 = vector.load %arg8[%c0_36, %c17_37] : memref<8x546xf32, #tpu.memory_space<vmem>>, vector<8x512xf32>
    %c4 = arith.constant 4 : index
    %c0_38 = arith.constant 0 : index
    %56 = vector.load %arg5[%c4, %c0_38] : memref<9x512xf32, #tpu.memory_space<vmem>>, vector<1x512xf32>
    %57 = vector.broadcast %56 : vector<1x512xf32> to vector<8x512xf32>
    %58 = arith.mulf %55, %57 : vector<8x512xf32>
    %c32 = arith.constant 32 : index
    %c0_39 = arith.constant 0 : index
    %59 = vector.load %arg9[%c32, %c0_39] : memref<72x512xf32, #tpu.memory_space<vmem>>, vector<8x512xf32>
    tpu.vector_store %arg9[%c32, %c0_39], %58 {strides = array<i32>} : memref<72x512xf32, #tpu.memory_space<vmem>>, vector<8x512xf32>,
    %c0_40 = arith.constant 0 : index
    %c18 = arith.constant 18 : index
    %60 = vector.load %arg8[%c0_40, %c18] : memref<8x546xf32, #tpu.memory_space<vmem>>, vector<8x512xf32>
    %c5 = arith.constant 5 : index
    %c0_41 = arith.constant 0 : index
    %61 = vector.load %arg5[%c5, %c0_41] : memref<9x512xf32, #tpu.memory_space<vmem>>, vector<1x512xf32>
    %62 = vector.broadcast %61 : vector<1x512xf32> to vector<8x512xf32>
    %63 = arith.mulf %60, %62 : vector<8x512xf32>
    %c40 = arith.constant 40 : index
    %c0_42 = arith.constant 0 : index
    %64 = vector.load %arg9[%c40, %c0_42] : memref<72x512xf32, #tpu.memory_space<vmem>>, vector<8x512xf32>
    tpu.vector_store %arg9[%c40, %c0_42], %63 {strides = array<i32>} : memref<72x512xf32, #tpu.memory_space<vmem>>, vector<8x512xf32>,
    %c0_43 = arith.constant 0 : index
    %c32_44 = arith.constant 32 : index
    %65 = vector.load %arg8[%c0_43, %c32_44] : memref<8x546xf32, #tpu.memory_space<vmem>>, vector<8x512xf32>
    %c6 = arith.constant 6 : index
    %c0_45 = arith.constant 0 : index
    %66 = vector.load %arg5[%c6, %c0_45] : memref<9x512xf32, #tpu.memory_space<vmem>>, vector<1x512xf32>
    %67 = vector.broadcast %66 : vector<1x512xf32> to vector<8x512xf32>
    %68 = arith.mulf %65, %67 : vector<8x512xf32>
    %c48 = arith.constant 48 : index
    %c0_46 = arith.constant 0 : index
    %69 = vector.load %arg9[%c48, %c0_46] : memref<72x512xf32, #tpu.memory_space<vmem>>, vector<8x512xf32>
    tpu.vector_store %arg9[%c48, %c0_46], %68 {strides = array<i32>} : memref<72x512xf32, #tpu.memory_space<vmem>>, vector<8x512xf32>,
    %c0_47 = arith.constant 0 : index
    %c33 = arith.constant 33 : index
    %70 = vector.load %arg8[%c0_47, %c33] : memref<8x546xf32, #tpu.memory_space<vmem>>, vector<8x512xf32>
    %c7 = arith.constant 7 : index
    %c0_48 = arith.constant 0 : index
    %71 = vector.load %arg5[%c7, %c0_48] : memref<9x512xf32, #tpu.memory_space<vmem>>, vector<1x512xf32>
    %72 = vector.broadcast %71 : vector<1x512xf32> to vector<8x512xf32>
    %73 = arith.mulf %70, %72 : vector<8x512xf32>
    %c56 = arith.constant 56 : index
    %c0_49 = arith.constant 0 : index
    %74 = vector.load %arg9[%c56, %c0_49] : memref<72x512xf32, #tpu.memory_space<vmem>>, vector<8x512xf32>
    tpu.vector_store %arg9[%c56, %c0_49], %73 {strides = array<i32>} : memref<72x512xf32, #tpu.memory_space<vmem>>, vector<8x512xf32>,
    %c0_50 = arith.constant 0 : index
    %c34 = arith.constant 34 : index
    %75 = vector.load %arg8[%c0_50, %c34] : memref<8x546xf32, #tpu.memory_space<vmem>>, vector<8x512xf32>
    %c8_51 = arith.constant 8 : index
    %c0_52 = arith.constant 0 : index
    %76 = vector.load %arg5[%c8_51, %c0_52] : memref<9x512xf32, #tpu.memory_space<vmem>>, vector<1x512xf32>
    %77 = vector.broadcast %76 : vector<1x512xf32> to vector<8x512xf32>
    %78 = arith.mulf %75, %77 : vector<8x512xf32>
    %c64 = arith.constant 64 : index
    %c0_53 = arith.constant 0 : index
    %79 = vector.load %arg9[%c64, %c0_53] : memref<72x512xf32, #tpu.memory_space<vmem>>, vector<8x512xf32>
    tpu.vector_store %arg9[%c64, %c0_53], %78 {strides = array<i32>} : memref<72x512xf32, #tpu.memory_space<vmem>>, vector<8x512xf32>,
    %c0_54 = arith.constant 0 : index
    %c0_55 = arith.constant 0 : index
    %80 = vector.load %arg2[%c0_54, %c0_55] : memref<8x72xf32, #tpu.memory_space<vmem>>, vector<8x72xf32>
    %c0_56 = arith.constant 0 : index
    %c0_57 = arith.constant 0 : index
    %81 = vector.load %arg9[%c0_56, %c0_57] : memref<72x512xf32, #tpu.memory_space<vmem>>, vector<72x512xf32>
    %cst_58 = arith.constant dense<0.000000e+00> : vector<8x512xf32>
    %82 = tpu.matmul %80, %81, %cst_58 {dimension_numbers = #tpu.dot_dimension_numbers<[1], [0], [0], [1], [0, 0, 1, 1], [], []>} : vector<8x72xf32>, vector<72x512xf32>, vector<8x512xf32> -> vector<8x512xf32>
    %c0_59 = arith.constant 0 : index
    %c0_60 = arith.constant 0 : index
    %c0_61 = arith.constant 0 : index
    %83 = vector.load %arg6[%c0_59, %c0_60, %c0_61] : memref<1x8x512xf32, #tpu.memory_space<vmem>>, vector<1x8x512xf32>
    %84 = vector.shape_cast %83 : vector<1x8x512xf32> to vector<8x512xf32>
    %85 = vector.shape_cast %82 : vector<8x512xf32> to vector<1x8x512xf32>
    tpu.vector_store %arg6[%c0_59, %c0_60, %c0_61], %85 {strides = array<i32>} : memref<1x8x512xf32, #tpu.memory_space<vmem>>, vector<1x8x512xf32>,
    %cst_62 = arith.constant dense<0.000000e+00> : vector<8xf32>
    %86 = vector.multi_reduction <add>, %82, %cst_62 [1] : vector<8x512xf32> to vector<8xf32>
    %87 = vector.shape_cast %86 : vector<8xf32> to vector<8x1xf32>
    %88 = arith.mulf %82, %82 : vector<8x512xf32>
    %cst_63 = arith.constant dense<0.000000e+00> : vector<8xf32>
    %89 = vector.multi_reduction <add>, %88, %cst_63 [1] : vector<8x512xf32> to vector<8xf32>
    %90 = vector.shape_cast %89 : vector<8xf32> to vector<8x1xf32>
    %91 = tpu.concatenate %87, %90 in 1 : vector<8x1xf32>, vector<8x1xf32> -> vector<8x2xf32>
    %c0_64 = arith.constant 0 : index
    %c0_65 = arith.constant 0 : index
    %c0_66 = arith.constant 0 : index
    %92 = vector.load %arg7[%c0_64, %c0_65, %c0_66] : memref<1x8x2xf32, #tpu.memory_space<vmem>>, vector<1x8x2xf32>
    %93 = vector.shape_cast %92 : vector<1x8x2xf32> to vector<8x2xf32>
    %94 = vector.shape_cast %91 : vector<8x2xf32> to vector<1x8x2xf32>
    tpu.vector_store %arg7[%c0_64, %c0_65, %c0_66], %94 {strides = array<i32>} : memref<1x8x2xf32, #tpu.memory_space<vmem>>, vector<1x8x2xf32>,
    return
  }
  func.func @transform_0(%arg0: i32) -> (i32, i32, i32) {
    %c0_i32 = arith.constant 0 : i32
    %c0_i32_0 = arith.constant 0 : i32
    %c0_i32_1 = arith.constant 0 : i32
    return %arg0, %c0_i32, %c0_i32_0 : i32, i32, i32
  }
  func.func @transform_1(%arg0: i32) -> (i32, i32) {
    %c0_i32 = arith.constant 0 : i32
    %c0_i32_0 = arith.constant 0 : i32
    %c0_i32_1 = arith.constant 0 : i32
    return %c0_i32, %c0_i32_0 : i32, i32
  }
  func.func @transform_2(%arg0: i32) -> (i32, i32, i32) {
    %c0_i32 = arith.constant 0 : i32
    %c0_i32_0 = arith.constant 0 : i32
    %c0_i32_1 = arith.constant 0 : i32
    %c0_i32_2 = arith.constant 0 : i32
    return %c0_i32, %c0_i32_0, %c0_i32_1 : i32, i32, i32
  }
  func.func @transform_3(%arg0: i32) -> (i32, i32) {
    %c0_i32 = arith.constant 0 : i32
    %c0_i32_0 = arith.constant 0 : i32
    %c0_i32_1 = arith.constant 0 : i32
    return %c0_i32, %c0_i32_0 : i32, i32
  }
  func.func @transform_4(%arg0: i32) -> (i32, i32) {
    %c0_i32 = arith.constant 0 : i32
    %c0_i32_0 = arith.constant 0 : i32
    %c0_i32_1 = arith.constant 0 : i32
    return %c0_i32, %c0_i32_0 : i32, i32
  }
  func.func @transform_5(%arg0: i32) -> (i32, i32, i32) {
    %c0_i32 = arith.constant 0 : i32
    %c0_i32_0 = arith.constant 0 : i32
    %c0_i32_1 = arith.constant 0 : i32
    return %arg0, %c0_i32, %c0_i32_0 : i32, i32, i32
  }
  func.func @transform_6(%arg0: i32) -> (i32, i32, i32) {
    %c0_i32 = arith.constant 0 : i32
    %c0_i32_0 = arith.constant 0 : i32
    %c0_i32_1 = arith.constant 0 : i32
    return %arg0, %c0_i32, %c0_i32_0 : i32, i32, i32
  }
}

</mosaic_0001>

<bundles_post_ra>
// kernel: residual_block.5
= control target key start
LH: loop header
LB: loop body
LE: loop exit
PB: predicated region body
PF: predicated region fallthrough
CT: control target
= control target key end

     0   :  { %s147_s25 = smov 1   ;;  %v148_v14 = vmov 0   ;;  %v150_v25 = vmov 1   ;;  %s238_s3 = inlined_call_operand.vmem [shape: f32[1,8,2], index: 3, kind: input, shape index: {}]   ;;  %s239_s2 = inlined_call_operand.vmem [shape: f32[1,16,2], index: 2, kind: input, shape index: {}]   ;;  %s240_s4 = inlined_call_operand.vmem [shape: f32[8,2], index: 4, kind: input, shape index: {}]   ;;  %s241_s5 = inlined_call_operand.vmem [shape: f32[8,2], index: 5, kind: input, shape index: {}]   ;;  %s242_s0 = inlined_call_operand.vmem [shape: f32[1,8,512], index: 0, kind: input, shape index: {}]   ;;  %s243_s1 = inlined_call_operand.vmem [shape: f32[1,8,512], index: 1, kind: input, shape index: {}]   ;;  %s244_s6 = inlined_call_operand.vmem [shape: f32[2,8,256], index: 6, kind: output, shape index: {}]  }
   0x1   :  { %v23_v0 = vld [vmem:[%s238_s3] sm:$0xff]  ;;  %v25_v1 = vld [vmem:[%s239_s2 + $0x8] sm:$0xff]  ;;  %139 = vset.pattern.permute.xlu0 %v148_v14  ;;  %140 = vset.pattern.permute.xlu1 %v148_v14  ;;  %s149_s2 = smov 127   ;;  %v74_v34 = vld [vmem:[%s242_s0 + $0x10] sm:$0xff] }
   0x2   :  { %v29_v2 = vmul.f32 0.001953125, %v23_v0  ;;  %v51_v3 = vmul.f32 0.001953125, %v25_v1  ;;  %v27_v17 = vld [vmem:[%s240_s4] sm:$0xff]  ;;  %v73_v32 = vld [vmem:[%s242_s0 + $0x8] sm:$0xff]  ;;  %v75_v35 = vld [vmem:[%s242_s0 + $0x18] sm:$0xff] }
   0x3   :  { %v50_v20 = vld [vmem:[%s241_s5] sm:$0xff]  ;;  %v95_v37 = vld [vmem:[%s243_s1 + $0x8] sm:$0xff]  ;;  %v96_v38 = vld [vmem:[%s243_s1 + $0x10] sm:$0xff] }
   0x4   :  { %v30_v4 = vmul.f32 %v29_v2, %v29_v2  ;;  %v52_v5 = vmul.f32 %v51_v3, %v51_v3  ;;  %v72_v31 = vld [vmem:[%s242_s0] sm:$0xff]  ;;  %v97_v39 = vld [vmem:[%s243_s1 + $0x18] sm:$0xff] }
   0x5   :  { %v94_v36 = vld [vmem:[%s243_s1] sm:$0xff] }
   0x6   :  { %32 = vrot.lane.b32.xlu0 %v30_v4, %s147_s25 }
   0xa   :  { %54 = vrot.lane.b32.xlu0 %v52_v5, %s147_s25 }
  0x78   :  { %v33_v6 = vpop.permute.xlu0 %32 }
  0x79   :  { %v35_v7 = vsub.f32 %v29_v2, %v33_v6 }
  0x7b   :  { %v36_v8 = vmax.f32 %v35_v7, 0.0 }
  0x7c   :  { %v55_v9 = vpop.permute.xlu0 %54 }
  0x7d   :  { %v37_v10 = vadd.f32 1e-05, %v36_v8  ;;  %v57_v11 = vsub.f32 %v51_v3, %v55_v9 }
  0x7f   :  { %143 = vrsqrt.f32 %v37_v10  ;;  %v58_v12 = vmax.f32 %v57_v11, 0.0 }
  0x81   :  { %v59_v13 = vadd.f32 1e-05, %v58_v12 }
  0x83   :  { %145 = vrsqrt.f32 %v59_v13 }
  0x8c   :  { %v144_v15 = vpop.eup %143 }
  0x8d   :  { %40 = vrot.lane.b32.xlu1 %v144_v15, %s149_s2 }
  0x90   :  { %v146_v16 = vpop.eup %145 }
  0x91   :  { %62 = vrot.lane.b32.xlu1 %v146_v16, %s149_s2 }
  0xff   :  { %v41_v18 = vpop.permute.xlu1 %40 }
 0x100   :  { %v43_v19 = vmul.f32 %v41_v18, %v27_v17 }
 0x102   :  { %v44_v21 = vmul.f32 %v43_v19, %v29_v2 }
 0x103   :  { %v63_v22 = vpop.permute.xlu1 %62 }
 0x104   :  { %v65_v23 = vmul.f32 %v63_v22, %v50_v20  ;;  %46 = vrot.lane.b32.xlu0 %v44_v21, %s147_s25 }
 0x106   :  { %v66_v24 = vmul.f32 %v65_v23, %v51_v3 }
 0x108   :  { %78 = vperm.xlu0 %139, %v43_v19   ;;  %68 = vrot.lane.b32.xlu1 %v66_v24, %s147_s25 }
 0x10c   :  { %100 = vperm.xlu1 %140, %v65_v23   ;;  %142 = vset.pattern.permute.xlu0 %v150_v25 }
 0x110   :  { %141 = vset.pattern.permute.xlu1 %v150_v25 }
 0x176   :  { %v47_v26 = vpop.permute.xlu0 %46 }
 0x177   :  { %v49_v27 = vsub.f32 %v27_v17, %v47_v26 }
 0x179   :  { %87 = vperm.xlu1 %141, %v49_v27  }
 0x17a   :  { %v69_v28 = vpop.permute.xlu1 %68 }
 0x17b   :  { %v71_v29 = vsub.f32 %v50_v20, %v69_v28 }
 0x17d   :  { %109 = vperm.xlu0 %142, %v71_v29  }
 0x183   :  { %v79_v33 = vpop.permute.xlu0 %78 }
 0x184   :  { %v81_v41 = vmul.f32 %v79_v33, %v72_v31  ;;  %v82_v42 = vmul.f32 %v79_v33, %v73_v32  ;;  %v83_v43 = vmul.f32 %v79_v33, %v74_v34  ;;  %v84_v44 = vmul.f32 %v79_v33, %v75_v35 }
 0x187   :  { %v101_v30 = vpop.permute.xlu1 %100 }
 0x188   :  { %v103_v45 = vmul.f32 %v101_v30, %v94_v36  ;;  %v104_v46 = vmul.f32 %v101_v30, %v95_v37  ;;  %v105_v47 = vmul.f32 %v101_v30, %v96_v38  ;;  %v106_v48 = vmul.f32 %v101_v30, %v97_v39 }
 0x1f4   :  { %v88_v40 = vpop.permute.xlu1 %87 }
 0x1f5   :  { %v90_v49 = vadd.f32 %v88_v40, %v81_v41  ;;  %v91_v50 = vadd.f32 %v88_v40, %v82_v42  ;;  %v92_v51 = vadd.f32 %v88_v40, %v83_v43  ;;  %v93_v52 = vadd.f32 %v88_v40, %v84_v44 }
 0x1f8   :  { %v110_v53 = vpop.permute.xlu0 %109 }
 0x1f9   :  { %v112_v54 = vadd.f32 %v110_v53, %v103_v45  ;;  %v113_v55 = vadd.f32 %v110_v53, %v104_v46  ;;  %v114_v56 = vadd.f32 %v110_v53, %v105_v47  ;;  %v115_v57 = vadd.f32 %v110_v53, %v106_v48 }
 0x1fb   :  { %v116_v58 = vadd.f32 %v112_v54, %v90_v49  ;;  %v117_v59 = vadd.f32 %v113_v55, %v91_v50  ;;  %v118_v60 = vadd.f32 %v114_v56, %v92_v51  ;;  %v119_v61 = vadd.f32 %v115_v57, %v93_v52 }
 0x1fd   :  { %v120_v62 = vmax.f32 %v116_v58, 0.0  ;;  %v121_v63 = vmax.f32 %v117_v59, 0.0  ;;  %v122_v0 = vmax.f32 %v118_v60, 0.0  ;;  %v123_v1 = vmax.f32 %v119_v61, 0.0 }
 0x1ff   :  { %124 = vst [vmem:[%s244_s6] sm:$0xff] %v120_v62  ;;  %125 = vst [vmem:[%s244_s6 + $0x8] sm:$0xff] %v121_v63 }
 0x200   :  { %133 = vst [vmem:[%s244_s6 + $0x10] sm:$0xff] %v122_v0  ;;  %134 = vst [vmem:[%s244_s6 + $0x18] sm:$0xff] %v123_v1 }

// kernel: residual_block.3
= control target key start
LH: loop header
LB: loop body
LE: loop exit
PB: predicated region body
PF: predicated region fallthrough
CT: control target
= control target key end

     0   :  { %v65_v0 = vlaneseq  ;;  %vm17_vm0 = vcmask 138240   ;;  %vm21_vm1 = vcmask 1047692   ;;  %v967_v3 = vmov 0.0   ;;  %s968_s22 = smov 17   ;;  %s969_s26 = smov 34   ;;  %s1395_s0 = inlined_call_operand.vmem [shape: f32[2,4,256], index: 0, kind: input, shape index: {}]   ;;  %s1396_s2 = inlined_call_operand.vmem [shape: f32[9,512], index: 2, kind: input, shape index: {}]   ;;  %s1397_s1 = inlined_call_operand.vmem [shape: f32[16,72], index: 1, kind: input, shape index: {}]   ;;  %s1398_s3 = inlined_call_operand.vmem [shape: f32[1,8,512], index: 3, kind: output, shape index: {0}]   ;;  %s1399_s4 = inlined_call_operand.vmem [shape: f32[1,8,512], index: 4, kind: output, shape index: {1}]   ;;  %s1400_s5 = inlined_call_operand.vmem [shape: f32[1,16,2], index: 5, kind: output, shape index: {2}]  }
   0x1   :  { %v935_v1 = vld [vmem:[%s1395_s0 + $0x8] sm:$0xff]  ;;  %v28_v2 = vld [vmem:[%s1395_s0] sm:$0xff]  ;;  %18 = vst.msk [vmem:[#allocation2] sm:$0xff] %vm17_vm0, %v967_v3  ;;  %23 = vst [vmem:[#allocation2 + $0x8] sm:$0xf0] %v967_v3  ;;  %793 = vmatprep.mubr.f32.mxu0 %v967_v3  ;;  %870 = vmatprep.mubr.f32.mxu1 %v967_v3  ;;  %s970_s29 = smov 33  }
   0x2   :  { %24 = vst [vmem:[#allocation2 + $0x10] sm:$0xf0] %v967_v3  ;;  %25 = vst [vmem:[#allocation2 + $0x18] sm:$0xf0] %v967_v3  ;;  %48 = vrot.lane.b32.xlu1 %v935_v1, %s968_s22  ;;  %v47_v4 = vcombine.high %v935_v1, %v935_v1  ;;  %31 = vrot.lane.b32.xlu0 %v28_v2, %s968_s22  ;;  %v30_v5 = vcombine.high %v28_v2, %v28_v2  ;;  %v66_v6 = vshrl.u32 %v65_v0, 7  ;;  %vm19_vm2 = vcmask 277640  }
   0x3   :  { %22 = vst.msk [vmem:[#allocation2] sm:$0xf0] %vm21_vm1, %v967_v3  ;;  %v943_v7 = vld [vmem:[%s1396_s2 + $0x20] ss:$8 sm:$0xf]  ;;  %vm26_vm3 = vcmask 138244  }
   0x4   :  { %v1034_v8 = vsub.s32 1, %v66_v6  ;;  %v1036_v9 = vsub.s32 0, %v66_v6  ;;  %v1042_v12 = vsub.s32 2, %v66_v6  ;;  %v942_v13 = vld [vmem:[%s1396_s2 + $0x7] ss:$8 sm:$0xf] }
   0x5   :  { %v1051_v16 = vsub.s32 3, %v66_v6  ;;  %v1056_v17 = vld [vmem:[%s1396_s2] ss:$8 sm:$0xf]  ;;  %20 = vst.msk [vmem:[#allocation2 + $0x20] sm:$0xff] %vm19_vm2, %v967_v3  ;;  %s971_s7 = smov 32  }
   0x6   :  { %50 = vrot.lane.b32.xlu1 %v47_v4, %s968_s22  ;;  %33 = vrot.lane.b32.xlu0 %v30_v5, %s968_s22  ;;  %v625_v10 = vrot.slane %v943_v7, %v1034_v8  ;;  %v621_v11 = vrot.slane %v943_v7, %v1036_v9  ;;  %v547_v14 = vrot.slane %v942_v13, %v1036_v9  ;;  %v941_v20 = vld [vmem:[%s1396_s2 + $0x6] ss:$8 sm:$0xf]  ;;  %v940_v29 = vld [vmem:[%s1396_s2 + $0x5] ss:$8 sm:$0xf] }
   0x7   :  { %v629_v15 = vrot.slane %v943_v7, %v1042_v12  ;;  %v555_v18 = vrot.slane %v942_v13, %v1042_v12  ;;  %v551_v19 = vrot.slane %v942_v13, %v1034_v8  ;;  %27 = vst.msk [vmem:[#allocation2 + $0x20] sm:$0xf0] %vm26_vm3, %v967_v3  ;;  %v72_v21 = vrot.slane %v1056_v17, %v1034_v8  ;;  %s972_s10 = smov 18   ;;  %v939_v34 = vld [vmem:[%s1396_s2 + $0x4] ss:$8 sm:$0xf] }
   0x8   :  { %v68_v22 = vrot.slane %v1056_v17, %v1036_v9  ;;  %v80_v23 = vrot.slane %v1056_v17, %v1051_v16  ;;  %v76_v24 = vrot.slane %v1056_v17, %v1042_v12  ;;  %v477_v25 = vrot.slane %v941_v20, %v1034_v8  ;;  %v938_v39 = vld [vmem:[%s1396_s2 + $0x3] ss:$8 sm:$0xf]  ;;  %s973_s15 = smov 16   ;;  %s974_s18 = smov 2  }
   0x9   :  { %v473_v26 = vrot.slane %v941_v20, %v1036_v9  ;;  %v633_v27 = vrot.slane %v943_v7, %v1051_v16  ;;  %v481_v28 = vrot.slane %v941_v20, %v1042_v12  ;;  %v403_v30 = vrot.slane %v940_v29, %v1034_v8  ;;  %v937_v44 = vld [vmem:[%s1396_s2 + $0x2] ss:$8 sm:$0xf]  ;;  %v936_v49 = vld [vmem:[%s1396_s2 + $0x1] ss:$8 sm:$0xf] }
   0xa   :  { %636 = vrot.lane.b32.xlu1 %v625_v10, %s969_s26  ;;  %634 = vrot.lane.b32.xlu0 %v621_v11, %s969_s26  ;;  %v399_v31 = vrot.slane %v940_v29, %v1036_v9  ;;  %v559_v32 = vrot.slane %v942_v13, %v1051_v16  ;;  %v407_v33 = vrot.slane %v940_v29, %v1042_v12  ;;  %s975_s21 = smov 1   ;;  %vm39_vm4 = vcmask 1043592   ;;  %s976_s2 = smov 94  }
   0xb   :  { %v330_v35 = vrot.slane %v939_v34, %v1034_v8  ;;  %v326_v36 = vrot.slane %v939_v34, %v1036_v9  ;;  %v485_v37 = vrot.slane %v941_v20, %v1051_v16  ;;  %v334_v38 = vrot.slane %v939_v34, %v1042_v12  ;;  %s978_s0 = smov 96   ;;  %s979_s23 = smov 110  }
   0xc   :  { %v256_v40 = vrot.slane %v938_v39, %v1034_v8  ;;  %v252_v41 = vrot.slane %v938_v39, %v1036_v9  ;;  %v411_v42 = vrot.slane %v940_v29, %v1051_v16  ;;  %v260_v43 = vrot.slane %v938_v39, %v1042_v12  ;;  %s980_s24 = smov 111   ;;  %s981_s25 = smov 112  }
   0xd   :  { %v182_v45 = vrot.slane %v937_v44, %v1034_v8  ;;  %v178_v46 = vrot.slane %v937_v44, %v1036_v9  ;;  %v338_v47 = vrot.slane %v939_v34, %v1051_v16  ;;  %v186_v48 = vrot.slane %v937_v44, %v1042_v12  ;;  %s983_s27 = smov 127  }
   0xe   :  { %560 = vrot.lane.b32.xlu1 %v547_v14, %s970_s29  ;;  %638 = vrot.lane.b32.xlu0 %v629_v15, %s969_s26  ;;  %v108_v50 = vrot.slane %v936_v49, %v1034_v8  ;;  %v104_v51 = vrot.slane %v936_v49, %v1036_v9  ;;  %v264_v52 = vrot.slane %v938_v39, %v1051_v16  ;;  %vm42_vm5 = vcmask 134144  }
   0xf   :  { %v112_v53 = vrot.slane %v936_v49, %v1042_v12  ;;  %v116_v54 = vrot.slane %v936_v49, %v1051_v16  ;;  %v190_v55 = vrot.slane %v937_v44, %v1051_v16  ;;  %vm642_vm6 = vcmask 277504  }
  0x10   :  { %vm568_vm7 = vcmask 269312   ;;  %vm494_vm8 = vcmask 261120   ;;  %vm420_vm9 = vcmask 146432   ;;  %vm273_vm10 = vcmask 130048  }
  0x11   :  { %vm199_vm11 = vcmask 15360   ;;  %vm125_vm12 = vcmask 7168   ;;  %vm671_vm13 = vcmask 769024   ;;  %vm597_vm14 = vcmask 777216  }
  0x12   :  { %564 = vrot.lane.b32.xlu1 %v555_v18, %s970_s29  ;;  %562 = vrot.lane.b32.xlu0 %v551_v19, %s970_s29  ;;  %vm523_vm15 = vcmask 785408   ;;  %vm375_vm1 = vcmask 908288   ;;  %vm302_vm2 = vcmask 916480   ;;  %vm228_vm3 = vcmask 1031168  }
  0x16   :  { %488 = vrot.lane.b32.xlu1 %v477_v25, %s971_s7  ;;  %486 = vrot.lane.b32.xlu0 %v473_v26, %s971_s7 }
  0x1a   :  { %640 = vrot.lane.b32.xlu1 %v633_v27, %s969_s26  ;;  %490 = vrot.lane.b32.xlu0 %v481_v28, %s971_s7  ;;  %s982_s26 = smov 126  }
  0x1e   :  { %414 = vrot.lane.b32.xlu1 %v403_v30, %s972_s10  ;;  %412 = vrot.lane.b32.xlu0 %v399_v31, %s972_s10 }
  0x22   :  { %566 = vrot.lane.b32.xlu1 %v559_v32, %s970_s29  ;;  %416 = vrot.lane.b32.xlu0 %v407_v33, %s972_s10 }
  0x26   :  { %341 = vrot.lane.b32.xlu1 %v330_v35, %s968_s22  ;;  %339 = vrot.lane.b32.xlu0 %v326_v36, %s968_s22 }
  0x2a   :  { %492 = vrot.lane.b32.xlu1 %v485_v37, %s971_s7  ;;  %343 = vrot.lane.b32.xlu0 %v334_v38, %s968_s22 }
  0x2e   :  { %267 = vrot.lane.b32.xlu1 %v256_v40, %s973_s15  ;;  %265 = vrot.lane.b32.xlu0 %v252_v41, %s973_s15 }
  0x32   :  { %418 = vrot.lane.b32.xlu1 %v411_v42, %s972_s10  ;;  %269 = vrot.lane.b32.xlu0 %v260_v43, %s973_s15 }
  0x36   :  { %193 = vrot.lane.b32.xlu1 %v182_v45, %s974_s18  ;;  %191 = vrot.lane.b32.xlu0 %v178_v46, %s974_s18 }
  0x3a   :  { %345 = vrot.lane.b32.xlu1 %v338_v47, %s968_s22  ;;  %195 = vrot.lane.b32.xlu0 %v186_v48, %s974_s18  ;;  %s977_s22 = smov 95  }
  0x3e   :  { %119 = vrot.lane.b32.xlu1 %v108_v50, %s975_s21  ;;  %117 = vrot.lane.b32.xlu0 %v104_v51, %s975_s21 }
  0x42   :  { %271 = vrot.lane.b32.xlu1 %v264_v52, %s973_s15  ;;  %121 = vrot.lane.b32.xlu0 %v112_v53, %s975_s21 }
  0x46   :  { %123 = vrot.lane.b32.xlu1 %v116_v54, %s975_s21  ;;  %197 = vrot.lane.b32.xlu0 %v190_v55, %s974_s18 }
  0x74   :  { %v49_v56 = vpop.permute.xlu1 %48  ;;  %v32_v57 = vpop.permute.xlu0 %31 }
  0x75   :  { %40 = vst.msk [vmem:[#allocation2] sm:$0xf] %vm39_vm4, %v32_v57 }
  0x78   :  { %v51_v58 = vpop.permute.xlu1 %50  ;;  %v34_v59 = vpop.permute.xlu0 %33 }
  0x79   :  { %v52_v60 = vsel %vm17_vm0, %v49_v56, %v51_v58  ;;  %58 = vst.msk [vmem:[#allocation2 + $0x20] sm:$0xf] %vm42_vm5, %v51_v58  ;;  %v35_v61 = vsel %vm17_vm0, %v32_v57, %v34_v59  ;;  %43 = vst.msk [vmem:[#allocation2 + $0x10] sm:$0xf] %vm42_vm5, %v34_v59  ;;  %vm722_vm5 = vcmask 588800  }
  0x7a   :  { %57 = vst [vmem:[#allocation2 + $0x18] sm:$0xf] %v52_v60  ;;  %41 = vst [vmem:[#allocation2 + $0x8] sm:$0xf] %v35_v61 }
  0x7b   :  { %56 = vst.msk [vmem:[#allocation2 + $0x10] sm:$0xf] %vm39_vm4, %v49_v56  ;;  %vm154_vm4 = vcmask 1039360  }
  0x7c   :  { %v1126_v62 = vpop.permute.xlu1 %636  ;;  %v1128_v63 = vld [vmem:[#allocation2] sm:$0xff]  ;;  %v635_v0 = vpop.permute.xlu0 %634 }
  0x7d   :  { %v651_v1 = vmul.f32 %v635_v0, %v1128_v63  ;;  %v1135_v2 = vmul.f32 %v1128_v63, %v68_v22  ;;  %v643_v38 = vsel %vm642_vm6, %v635_v0, %v1126_v62 }
  0x7f   :  { %661 = vrot.lane.b32.xlu0 %v651_v1, %s976_s2 }
  0x80   :  { %v1138_v4 = vpop.permute.xlu1 %560  ;;  %v1140_v5 = vpop.permute.xlu0 %638  ;;  %v1185_v28 = vld [vmem:[#allocation2 + $0x20] sm:$0xff] }
  0x81   :  { %v1142_v6 = vld [vmem:[#allocation2 + $0x8] sm:$0xff]  ;;  %v577_v7 = vmul.f32 %v1128_v63, %v1138_v4  ;;  %v1148_v11 = vld [vmem:[#allocation2 + $0x18] sm:$0xff]  ;;  %v644_v46 = vsel %vm642_vm6, %v1126_v62, %v1140_v5 }
  0x82   :  { %v1146_v10 = vld [vmem:[#allocation2 + $0x10] sm:$0xff]  ;;  %v1154_v9 = vmul.f32 %v1142_v6, %v72_v21  ;;  %v1160_v13 = vmul.f32 %v1148_v11, %v80_v23  ;;  %v652_v40 = vmul.f32 %v643_v38, %v1142_v6 }
  0x83   :  { %587 = vrot.lane.b32.xlu1 %v577_v7, %s977_s22  ;;  %v1167_v14 = vmul.f32 %v1146_v10, %v76_v24  ;;  %v653_v48 = vmul.f32 %v644_v46, %v1146_v10 }
  0x84   :  { %v1169_v15 = vpop.permute.xlu1 %564  ;;  %v563_v8 = vpop.permute.xlu0 %562 }
  0x85   :  { %v570_v42 = vsel %vm568_vm7, %v563_v8, %v1169_v15  ;;  %v569_v50 = vsel %vm568_vm7, %v1138_v4, %v563_v8 }
  0x86   :  { %v579_v44 = vmul.f32 %v1146_v10, %v570_v42  ;;  %v578_v52 = vmul.f32 %v1142_v6, %v569_v50 }
  0x88   :  { %v489_v18 = vpop.permute.xlu1 %488  ;;  %v487_v19 = vpop.permute.xlu0 %486 }
  0x89   :  { %v503_v20 = vmul.f32 %v1128_v63, %v487_v19  ;;  %v495_v47 = vsel %vm494_vm8, %v487_v19, %v489_v18 }
  0x8a   :  { %v504_v49 = vmul.f32 %v1142_v6, %v495_v47 }
  0x8b   :  { %513 = vrot.lane.b32.xlu0 %v503_v20, %s978_s0 }
  0x8c   :  { %v641_v16 = vpop.permute.xlu1 %640  ;;  %v1173_v21 = vpop.permute.xlu0 %490 }
  0x8d   :  { %v655_v36 = vmul.f32 %v641_v16, %v1185_v28  ;;  %v645_v51 = vsel %vm642_vm6, %v1140_v5, %v641_v16  ;;  %v496_v54 = vsel %vm494_vm8, %v489_v18, %v1173_v21 }
  0x8e   :  { %v654_v53 = vmul.f32 %v645_v51, %v1148_v11  ;;  %v505_v57 = vmul.f32 %v1146_v10, %v496_v54 }
  0x90   :  { %v415_v22 = vpop.permute.xlu1 %414  ;;  %v413_v23 = vpop.permute.xlu0 %412 }
  0x91   :  { %v429_v12 = vmul.f32 %v1128_v63, %v413_v23  ;;  %v421_v59 = vsel %vm420_vm9, %v413_v23, %v415_v22 }
  0x92   :  { %v430_v61 = vmul.f32 %v1142_v6, %v421_v59 }
  0x93   :  { %439 = vrot.lane.b32.xlu1 %v429_v12, %s979_s23 }
  0x94   :  { %v1177_v17 = vpop.permute.xlu1 %566  ;;  %v1179_v24 = vpop.permute.xlu0 %416 }
  0x95   :  { %v581_v31 = vmul.f32 %v1185_v28, %v1177_v17  ;;  %v422_v55 = vsel %vm420_vm9, %v415_v22, %v1179_v24  ;;  %v571_v1 = vsel %vm568_vm7, %v1169_v15, %v1177_v17 }
  0x96   :  { %v431_v58 = vmul.f32 %v1146_v10, %v422_v55  ;;  %v580_v5 = vmul.f32 %v1148_v11, %v571_v1 }
  0x98   :  { %v1181_v25 = vpop.permute.xlu1 %341  ;;  %v340_v26 = vpop.permute.xlu0 %339 }
  0x99   :  { %v355_v27 = vmul.f32 %v1128_v63, %v340_v26  ;;  %v347_v60 = vsel %vm17_vm0, %v340_v26, %v1181_v25 }
  0x9a   :  { %v356_v62 = vmul.f32 %v1142_v6, %v347_v60 }
  0x9b   :  { %365 = vrot.lane.b32.xlu0 %v355_v27, %s980_s24 }
  0x9c   :  { %v493_v29 = vpop.permute.xlu1 %492  ;;  %v1187_v30 = vpop.permute.xlu0 %343 }
  0x9d   :  { %v507_v41 = vmul.f32 %v1185_v28, %v493_v29  ;;  %v497_v4 = vsel %vm494_vm8, %v1173_v21, %v493_v29  ;;  %v348_v8 = vsel %vm17_vm0, %v1181_v25, %v1187_v30 }
  0x9e   :  { %v506_v7 = vmul.f32 %v1148_v11, %v497_v4  ;;  %v357_v19 = vmul.f32 %v1146_v10, %v348_v8 }
  0x9f   :  { %595 = vrot.lane.b32.xlu0 %v581_v31, %s977_s22 }
  0xa0   :  { %v1192_v32 = vpop.permute.xlu1 %267  ;;  %v1194_v33 = vpop.permute.xlu0 %265 }
  0xa1   :  { %v282_v34 = vmul.f32 %v1128_v63, %v1194_v33  ;;  %v274_v16 = vsel %vm273_vm10, %v1194_v33, %v1192_v32 }
  0xa2   :  { %v283_v22 = vmul.f32 %v1142_v6, %v274_v16 }
  0xa3   :  { %292 = vrot.lane.b32.xlu1 %v282_v34, %s981_s25 }
  0xa4   :  { %v1199_v35 = vpop.permute.xlu1 %418  ;;  %v270_v56 = vpop.permute.xlu0 %269 }
  0xa5   :  { %v433_v37 = vmul.f32 %v1185_v28, %v1199_v35  ;;  %v275_v18 = vsel %vm273_vm10, %v1192_v32, %v270_v56  ;;  %v423_v17 = vsel %vm420_vm9, %v1179_v24, %v1199_v35 }
  0xa6   :  { %v284_v20 = vmul.f32 %v1146_v10, %v275_v18  ;;  %v432_v26 = vmul.f32 %v1148_v11, %v423_v17 }
  0xa7   :  { %447 = vrot.lane.b32.xlu0 %v433_v37, %s979_s23  ;;  %669 = vrot.lane.b32.xlu1 %v655_v36, %s976_s2 }
  0xa8   :  { %v1208_v39 = vpop.permute.xlu1 %193  ;;  %v192_v0 = vpop.permute.xlu0 %191 }
  0xa9   :  { %v200_v21 = vsel %vm199_vm11, %v192_v0, %v1208_v39  ;;  %v208_v24 = vmul.f32 %v1128_v63, %v192_v0 }
  0xaa   :  { %v209_v23 = vmul.f32 %v1142_v6, %v200_v21 }
  0xab   :  { %663 = vrot.lane.b32.xlu0 %v652_v40, %s976_s2  ;;  %521 = vrot.lane.b32.xlu1 %v507_v41, %s978_s0 }
  0xac   :  { %v346_v43 = vpop.permute.xlu1 %345  ;;  %v196_v15 = vpop.permute.xlu0 %195 }
  0xad   :  { %v359_v45 = vmul.f32 %v1185_v28, %v346_v43  ;;  %v349_v25 = vsel %vm17_vm0, %v1187_v30, %v346_v43  ;;  %v201_v31 = vsel %vm199_vm11, %v1208_v39, %v196_v15  ;;  %vm449_vm0 = vcmask 900096  }
  0xae   :  { %v358_v27 = vmul.f32 %v1148_v11, %v349_v25  ;;  %v210_v30 = vmul.f32 %v1146_v10, %v201_v31 }
  0xaf   :  { %591 = vrot.lane.b32.xlu0 %v579_v44, %s977_s22  ;;  %373 = vrot.lane.b32.xlu1 %v359_v45, %s980_s24 }
  0xb0   :  { %v118_v12 = vpop.permute.xlu0 %117  ;;  %v120_v29 = vpop.permute.xlu1 %119 }
  0xb1   :  { %v126_v33 = vsel %vm125_vm12, %v118_v12, %v120_v29 }
  0xb2   :  { %v135_v36 = vmul.f32 %v1142_v6, %v126_v33  ;;  %v134_v6 = vmul.f32 %v1128_v63, %v118_v12 }
  0xb3   :  { %515 = vrot.lane.b32.xlu0 %v504_v49, %s978_s0  ;;  %665 = vrot.lane.b32.xlu1 %v653_v48, %s976_s2 }
  0xb4   :  { %v122_v32 = vpop.permute.xlu0 %121  ;;  %v272_v35 = vpop.permute.xlu1 %271 }
  0xb5   :  { %v127_v34 = vsel %vm125_vm12, %v120_v29, %v122_v32  ;;  %v276_v38 = vsel %vm273_vm10, %v270_v56, %v272_v35  ;;  %v286_v41 = vmul.f32 %v1185_v28, %v272_v35 }
  0xb6   :  { %v136_v37 = vmul.f32 %v1146_v10, %v127_v34  ;;  %v285_v40 = vmul.f32 %v1148_v11, %v276_v38 }
  0xb7   :  { %667 = vrot.lane.b32.xlu0 %v654_v53, %s976_s2  ;;  %589 = vrot.lane.b32.xlu1 %v578_v52, %s977_s22 }
  0xb8   :  { %v198_v39 = vpop.permute.xlu0 %197  ;;  %v124_v43 = vpop.permute.xlu1 %123 }
  0xb9   :  { %v202_v42 = vsel %vm199_vm11, %v196_v15, %v198_v39  ;;  %v128_v44 = vsel %vm125_vm12, %v122_v32, %v124_v43  ;;  %v212_v46 = vmul.f32 %v1185_v28, %v198_v39  ;;  %v138_v47 = vmul.f32 %v1185_v28, %v124_v43 }
  0xba   :  { %v211_v10 = vmul.f32 %v1148_v11, %v202_v42  ;;  %v137_v45 = vmul.f32 %v1148_v11, %v128_v44 }
  0xbb   :  { %443 = vrot.lane.b32.xlu0 %v431_v58, %s979_s23  ;;  %517 = vrot.lane.b32.xlu1 %v505_v57, %s978_s0 }
  0xbf   :  { %367 = vrot.lane.b32.xlu0 %v356_v62, %s980_s24  ;;  %441 = vrot.lane.b32.xlu1 %v430_v61, %s979_s23 }
  0xc3   :  { %519 = vrot.lane.b32.xlu0 %v506_v7, %s978_s0  ;;  %593 = vrot.lane.b32.xlu1 %v580_v5, %s977_s22 }
  0xc7   :  { %369 = vrot.lane.b32.xlu1 %v357_v19, %s980_s24  ;;  %296 = vrot.lane.b32.xlu0 %v284_v20, %s981_s25 }
  0xcb   :  { %294 = vrot.lane.b32.xlu1 %v283_v22, %s981_s25  ;;  %220 = vrot.lane.b32.xlu0 %v209_v23, %s982_s26 }
  0xcf   :  { %445 = vrot.lane.b32.xlu1 %v432_v26, %s979_s23  ;;  %371 = vrot.lane.b32.xlu0 %v358_v27, %s980_s24 }
  0xd3   :  { %218 = vrot.lane.b32.xlu0 %v208_v24, %s982_s26  ;;  %222 = vrot.lane.b32.xlu1 %v210_v30, %s982_s26 }
  0xd7   :  { %146 = vrot.lane.b32.xlu1 %v135_v36, %s983_s27  ;;  %148 = vrot.lane.b32.xlu0 %v136_v37, %s983_s27 }
  0xdb   :  { %298 = vrot.lane.b32.xlu1 %v285_v40, %s981_s25  ;;  %300 = vrot.lane.b32.xlu0 %v286_v41, %s981_s25 }
  0xdf   :  { %144 = vrot.lane.b32.xlu1 %v134_v6, %s983_s27  ;;  %224 = vrot.lane.b32.xlu0 %v211_v10, %s982_s26 }
  0xe3   :  { %226 = vrot.lane.b32.xlu1 %v212_v46, %s982_s26  ;;  %150 = vrot.lane.b32.xlu0 %v137_v45, %s983_s27 }
  0xe7   :  { %152 = vrot.lane.b32.xlu1 %v138_v47, %s983_s27 }
  0xf1   :  { %v662_v48 = vpop.permute.xlu0 %661 }
  0xf5   :  { %v588_v63 = vpop.permute.xlu1 %587 }
  0xfd   :  { %v514_v49 = vpop.permute.xlu0 %513 }
 0x105   :  { %v440_v51 = vpop.permute.xlu1 %439 }
 0x10d   :  { %v366_v50 = vpop.permute.xlu0 %365 }
 0x111   :  { %v596_v52 = vpop.permute.xlu0 %595 }
 0x115   :  { %v293_v53 = vpop.permute.xlu1 %292 }
 0x119   :  { %v670_v54 = vpop.permute.xlu1 %669  ;;  %v1311_v55 = vpop.permute.xlu0 %447 }
 0x11d   :  { %v522_v56 = vpop.permute.xlu1 %521  ;;  %v664_v11 = vpop.permute.xlu0 %663 }
 0x11e   :  { %v672_v61 = vsel %vm671_vm13, %v662_v48, %v664_v11 }
 0x121   :  { %v1313_v57 = vpop.permute.xlu1 %373  ;;  %v592_v58 = vpop.permute.xlu0 %591 }
 0x125   :  { %v666_v59 = vpop.permute.xlu1 %665  ;;  %v516_v60 = vpop.permute.xlu0 %515 }
 0x126   :  { %v673_v28 = vsel %vm671_vm13, %v664_v11, %v666_v59  ;;  %v524_v19 = vsel %vm523_vm15, %v514_v49, %v516_v60  ;;  %v685_v11 = vld [vmem:[%s1397_s1 + $0x8] sm:$0xff] }
 0x127   :  { %743 = vmatprep.subr.mxu0 %v673_v28 }
 0x128   :  { %744 = vmatpush1.msra.mxu0 %v672_v61 }
 0x129   :  { %v590_v62 = vpop.permute.xlu1 %589  ;;  %v668_v0 = vpop.permute.xlu0 %667 }
 0x12a   :  { %v599_v1 = vsel %vm597_vm14, %v590_v62, %v592_v58  ;;  %v675_v4 = vsel %vm671_vm13, %v668_v0, %v670_v54  ;;  %v598_v5 = vsel %vm597_vm14, %v588_v63, %v590_v62  ;;  %v674_v7 = vsel %vm671_vm13, %v666_v59, %v668_v0 }
 0x12b   :  { %745 = vmatprep.subr.mxu0 %v599_v1  ;;  %820 = vmatprep.subr.mxu1 %v675_v4 }
 0x12c   :  { %746 = vmatpush1.msra.mxu0 %v598_v5  ;;  %821 = vmatpush1.msra.mxu1 %v674_v7 }
 0x12d   :  { %v518_v8 = vpop.permute.xlu1 %517  ;;  %v444_v18 = vpop.permute.xlu0 %443 }
 0x12e   :  { %v525_v15 = vsel %vm523_vm15, %v516_v60, %v518_v8 }
 0x12f   :  { %747 = vmatprep.subr.mxu0 %v525_v15 }
 0x130   :  { %748 = vmatpush1.msra.mxu0 %v524_v19 }
 0x131   :  { %v442_v20 = vpop.permute.xlu1 %441  ;;  %v368_v16 = vpop.permute.xlu0 %367 }
 0x132   :  { %v451_v21 = vsel %vm449_vm0, %v442_v20, %v444_v18  ;;  %v450_v22 = vsel %vm449_vm0, %v440_v51, %v442_v20  ;;  %v376_v24 = vsel %vm375_vm1, %v366_v50, %v368_v16 }
 0x133   :  { %749 = vmatprep.subr.mxu0 %v451_v21 }
 0x134   :  { %750 = vmatpush1.msra.mxu0 %v450_v22 }
 0x135   :  { %v594_v23 = vpop.permute.xlu1 %593  ;;  %v520_v12 = vpop.permute.xlu0 %519 }
 0x136   :  { %v601_v17 = vsel %vm597_vm14, %v594_v23, %v596_v52  ;;  %v600_v25 = vsel %vm597_vm14, %v592_v58, %v594_v23  ;;  %v527_v26 = vsel %vm523_vm15, %v520_v12, %v522_v56  ;;  %v526_v31 = vsel %vm523_vm15, %v518_v8, %v520_v12 }
 0x137   :  { %822 = vmatprep.subr.mxu1 %v601_v17 }
 0x138   :  { %823 = vmatpush1.msra.mxu1 %v600_v25 }
 0x139   :  { %v370_v27 = vpop.permute.xlu1 %369  ;;  %824 = vmatprep.subr.mxu1 %v527_v26  ;;  %v297_v29 = vpop.permute.xlu0 %296 }
 0x13a   :  { %825 = vmatpush1.msra.mxu1 %v526_v31  ;;  %v377_v32 = vsel %vm375_vm1, %v368_v16, %v370_v27 }
 0x13b   :  { %751 = vmatprep.subr.mxu0 %v377_v32 }
 0x13c   :  { %752 = vmatpush1.msra.mxu0 %v376_v24 }
 0x13d   :  { %v295_v30 = vpop.permute.xlu1 %294  ;;  %v221_v33 = vpop.permute.xlu0 %220 }
 0x13e   :  { %v304_v34 = vsel %vm302_vm2, %v295_v30, %v297_v29  ;;  %v303_v35 = vsel %vm302_vm2, %v293_v53, %v295_v30  ;;  %v684_v53 = vld [vmem:[%s1397_s1] sm:$0xff] }
 0x13f   :  { %753 = vmatprep.subr.mxu0 %v304_v34 }
 0x140   :  { %754 = vmatpush1.msra.mxu0 %v303_v35 }
 0x141   :  { %v446_v36 = vpop.permute.xlu1 %445  ;;  %v372_v37 = vpop.permute.xlu0 %371 }
 0x142   :  { %v453_v38 = vsel %vm449_vm0, %v446_v36, %v1311_v55  ;;  %v452_v39 = vsel %vm449_vm0, %v444_v18, %v446_v36  ;;  %v379_v40 = vsel %vm375_vm1, %v372_v37, %v1313_v57  ;;  %v378_v43 = vsel %vm375_vm1, %v370_v27, %v372_v37 }
 0x143   :  { %826 = vmatprep.subr.mxu1 %v453_v38 }
 0x144   :  { %827 = vmatpush1.msra.mxu1 %v452_v39 }
 0x145   :  { %v223_v41 = vpop.permute.xlu1 %222  ;;  %828 = vmatprep.subr.mxu1 %v379_v40  ;;  %v219_v42 = vpop.permute.xlu0 %218 }
 0x146   :  { %829 = vmatpush1.msra.mxu1 %v378_v43  ;;  %v230_v6 = vsel %vm228_vm3, %v221_v33, %v223_v41  ;;  %v229_v10 = vsel %vm228_vm3, %v219_v42, %v221_v33 }
 0x147   :  { %755 = vmatprep.subr.mxu0 %v230_v6 }
 0x148   :  { %756 = vmatpush1.msra.mxu0 %v229_v10 }
 0x149   :  { %v147_v44 = vpop.permute.xlu1 %146  ;;  %v149_v45 = vpop.permute.xlu0 %148 }
 0x14a   :  { %v156_v46 = vsel %vm154_vm4, %v147_v44, %v149_v45 }
 0x14b   :  { %757 = vmatprep.subr.mxu0 %v156_v46 }
 0x14d   :  { %v299_v47 = vpop.permute.xlu1 %298  ;;  %v301_v48 = vpop.permute.xlu0 %300 }
 0x14e   :  { %v306_v49 = vsel %vm302_vm2, %v299_v47, %v301_v48  ;;  %v305_v63 = vsel %vm302_vm2, %v297_v29, %v299_v47 }
 0x14f   :  { %830 = vmatprep.subr.mxu1 %v306_v49 }
 0x150   :  { %831 = vmatpush1.msra.mxu1 %v305_v63 }
 0x151   :  { %v145_v50 = vpop.permute.xlu1 %144  ;;  %v225_v51 = vpop.permute.xlu0 %224 }
 0x152   :  { %v155_v52 = vsel %vm154_vm4, %v145_v50, %v147_v44  ;;  %v231_v56 = vsel %vm228_vm3, %v223_v41, %v225_v51 }
 0x153   :  { %758 = vmatpush1.msra.mxu0 %v155_v52 }
 0x154   :  { %759 = vmatprep.subr.mxu0 %v1154_v9 }
 0x155   :  { %v227_v54 = vpop.permute.xlu1 %226  ;;  %760 = vmatpush1.msra.mxu0 %v1135_v2  ;;  %v151_v57 = vpop.permute.xlu0 %150 }
 0x156   :  { %v232_v55 = vsel %vm228_vm3, %v225_v51, %v227_v54  ;;  %944 = vmatmul.mubr.msk.f32.vlgmr.msra.gmra.mxu0 %vm722_vm5, %v684_v53  ;;  %v157_v2 = vsel %vm154_vm4, %v149_v45, %v151_v57 }
 0x157   :  { %832 = vmatprep.subr.mxu1 %v232_v55  ;;  %799 = vmatprep.mubr.f32.mxu0 %v967_v3 }
 0x158   :  { %833 = vmatpush1.msra.mxu1 %v231_v56 }
 0x159   :  { %v153_v58 = vpop.permute.xlu1 %152 }
 0x15a   :  { %v158_v9 = vsel %vm154_vm4, %v151_v57, %v153_v58  ;;  %945 = vmatmul.mubr.msk.f32.gmra.mxu0 %vm722_vm5, %v685_v11 }
 0x15b   :  { %834 = vmatprep.subr.mxu1 %v158_v9 }
 0x15c   :  { %835 = vmatpush1.msra.mxu1 %v157_v2 }
 0x15d   :  { %836 = vmatprep.subr.mxu1 %v1160_v13 }
 0x15e   :  { %837 = vmatpush1.msra.mxu1 %v1167_v14 }
 0x15f   :  { %946 = vmatmul.mubr.msk.f32.vlgmr.msra.gmra.mxu1 %vm722_vm5, %v684_v53 }
 0x160   :  { %876 = vmatprep.mubr.f32.mxu1 %v967_v3 }
 0x163   :  { %947 = vmatmul.mubr.msk.f32.gmra.mxu1 %vm722_vm5, %v685_v11 }
 0x216   :  { %v795_v59 = vpop.f32.mrf.mxu0 }
 0x217   :  { %883 = vst [vmem:[%s1398_s3] sm:$0xff] %v795_v59  ;;  %v901_v13 = vmul.f32 %v795_v59, %v795_v59 }
 0x218   :  { %v797_v60 = vpop.f32.mrf.mxu0 }
 0x219   :  { %884 = vst [vmem:[%s1398_s3 + $0x8] sm:$0xff] %v797_v60  ;;  %v902_v14 = vmul.f32 %v797_v60, %v797_v60  ;;  %v891_v61 = vadd.f32 %v797_v60, %v795_v59 }
 0x21a   :  { %v801_v28 = vpop.f32.mrf.mxu0 }
 0x21b   :  { %887 = vst [vmem:[%s1399_s4] sm:$0xff] %v801_v28  ;;  %v905_v62 = vmul.f32 %v801_v28, %v801_v28  ;;  %v909_v8 = vadd.f32 %v902_v14, %v901_v13 }
 0x21c   :  { %v803_v3 = vpop.f32.mrf.mxu0 }
 0x21d   :  { %888 = vst [vmem:[%s1399_s4 + $0x8] sm:$0xff] %v803_v3  ;;  %v906_v0 = vmul.f32 %v803_v3, %v803_v3  ;;  %v896_v5 = vadd.f32 %v803_v3, %v801_v28 }
 0x21f   :  { %v872_v1 = vpop.f32.mrf.mxu1  ;;  %v914_v15 = vadd.f32 %v906_v0, %v905_v62 }
 0x220   :  { %885 = vst [vmem:[%s1398_s3 + $0x10] sm:$0xff] %v872_v1  ;;  %v903_v4 = vmul.f32 %v872_v1, %v872_v1  ;;  %v892_v7 = vadd.f32 %v891_v61, %v872_v1 }
 0x221   :  { %v874_v18 = vpop.f32.mrf.mxu1 }
 0x222   :  { %886 = vst [vmem:[%s1398_s3 + $0x18] sm:$0xff] %v874_v18  ;;  %v893_v19 = vadd.f32 %v892_v7, %v874_v18  ;;  %v904_v20 = vmul.f32 %v874_v18, %v874_v18  ;;  %v910_v16 = vadd.f32 %v909_v8, %v903_v4 }
 0x223   :  { %v878_v21 = vpop.f32.mrf.mxu1 }
 0x224   :  { %889 = vst [vmem:[%s1399_s4 + $0x10] sm:$0xff] %v878_v21  ;;  %v907_v22 = vmul.f32 %v878_v21, %v878_v21  ;;  %894 = vadd.xlane.f32.xlu0 %v893_v19  ;;  %v897_v23 = vadd.f32 %v896_v5, %v878_v21  ;;  %v911_v25 = vadd.f32 %v910_v16, %v904_v20 }
 0x225   :  { %v880_v12 = vpop.f32.mrf.mxu1 }
 0x226   :  { %890 = vst [vmem:[%s1399_s4 + $0x18] sm:$0xff] %v880_v12  ;;  %v908_v17 = vmul.f32 %v880_v12, %v880_v12  ;;  %v898_v26 = vadd.f32 %v897_v23, %v880_v12  ;;  %v915_v27 = vadd.f32 %v914_v15, %v907_v22 }
 0x228   :  { %912 = vadd.xlane.f32.xlu0 %v911_v25  ;;  %899 = vadd.xlane.f32.xlu1 %v898_v26  ;;  %v916_v29 = vadd.f32 %v915_v27, %v908_v17 }
 0x22c   :  { %917 = vadd.xlane.f32.xlu0 %v916_v29 }
 0x2ad   :  { %v895_v31 = vpop.xlane.xlu0 %894 }
 0x2b1   :  { %v913_v32 = vpop.xlane.xlu0 %912  ;;  %v900_v30 = vpop.xlane.xlu1 %899 }
 0x2b2   :  { %v919_v24 = vsel %vm125_vm12, %v895_v31, %v913_v32 }
 0x2b3   :  { %921 = vst.msk [vmem:[%s1400_s5] sm:$0xff] %vm199_vm11, %v919_v24 }
 0x2b5   :  { %v918_v33 = vpop.xlane.xlu0 %917 }
 0x2b6   :  { %v920_v34 = vsel %vm125_vm12, %v900_v30, %v918_v33 }
 0x2b7   :  { %922 = vst.msk [vmem:[%s1400_s5 + $0x8] sm:$0xff] %vm199_vm11, %v920_v34 }

// kernel: residual_block.4
= control target key start
LH: loop header
LB: loop body
LE: loop exit
PB: predicated region body
PF: predicated region fallthrough
CT: control target
= control target key end

     0   :  { %s972_s23 = smov 1   ;;  %v973_v7 = vmov 0   ;;  %s974_s24 = smov 127   ;;  %v975_v9 = vmov 1   ;;  %v109_v14 = vlaneseq  ;;  %vm73_vm0 = vcmask 138240   ;;  %s1482_s2 = inlined_call_operand.vmem [shape: f32[1,16,2], index: 2, kind: input, shape index: {}]   ;;  %s1483_s3 = inlined_call_operand.vmem [shape: f32[8,2], index: 3, kind: input, shape index: {}]   ;;  %s1484_s4 = inlined_call_operand.vmem [shape: f32[9,512], index: 4, kind: input, shape index: {}]   ;;  %s1485_s0 = inlined_call_operand.vmem [shape: f32[1,8,512], index: 0, kind: input, shape index: {}]   ;;  %s1486_s1 = inlined_call_operand.vmem [shape: f32[8,72], index: 1, kind: input, shape index: {}]   ;;  %s1487_s5 = inlined_call_operand.vmem [shape: f32[1,8,512], index: 5, kind: output, shape index: {0}]   ;;  %s1488_s6 = inlined_call_operand.vmem [shape: f32[1,8,2], index: 6, kind: output, shape index: {1}]  }
   0x1   :  { %v22_v0 = vld [vmem:[%s1482_s2] sm:$0xff]  ;;  %968 = vset.pattern.permute.xlu1 %v973_v7  ;;  %969 = vset.pattern.permute.xlu0 %v975_v9  ;;  %s977_s30 = smov 33   ;;  %s978_s9 = smov 32   ;;  %v983_v58 = vmov 0.0   ;;  %v49_v61 = vld [vmem:[%s1485_s0 + $0x10] sm:$0xff]  ;;  %v48_v62 = vld [vmem:[%s1485_s0 + $0x8] sm:$0xff] }
   0x2   :  { %v26_v1 = vmul.f32 0.001953125, %v22_v0  ;;  %v24_v10 = vld [vmem:[%s1483_s3] sm:$0xff]  ;;  %v110_v15 = vshrl.u32 %v109_v14, 7  ;;  %s976_s3 = smov 34   ;;  %s979_s12 = smov 18   ;;  %74 = vst.msk [vmem:[#allocation2] sm:$0xff] %vm73_vm0, %v983_v58  ;;  %833 = vmatprep.mubr.f32.mxu0 %v983_v58  ;;  %904 = vmatprep.mubr.f32.mxu1 %v983_v58 }
   0x3   :  { %v946_v16 = vld [vmem:[%s1484_s4 + $0x20] ss:$8 sm:$0xf]  ;;  %v945_v19 = vld [vmem:[%s1484_s4 + $0x7] ss:$8 sm:$0xf] }
   0x4   :  { %v27_v2 = vmul.f32 %v26_v1, %v26_v1  ;;  %v1038_v17 = vsub.s32 1, %v110_v15  ;;  %v1040_v18 = vsub.s32 0, %v110_v15  ;;  %v1048_v22 = vsub.s32 2, %v110_v15  ;;  %v944_v24 = vld [vmem:[%s1484_s4 + $0x6] ss:$8 sm:$0xf] }
   0x5   :  { %v1057_v26 = vsub.s32 3, %v110_v15  ;;  %v943_v28 = vld [vmem:[%s1484_s4 + $0x5] ss:$8 sm:$0xf]  ;;  %s980_s15 = smov 17   ;;  %s981_s18 = smov 16  }
   0x6   :  { %29 = vrot.lane.b32.xlu0 %v27_v2, %s972_s23  ;;  %v669_v20 = vrot.slane %v946_v16, %v1038_v17  ;;  %v591_v21 = vrot.slane %v945_v19, %v1040_v18  ;;  %v599_v23 = vrot.slane %v945_v19, %v1048_v22  ;;  %v521_v25 = vrot.slane %v944_v24, %v1038_v17  ;;  %v942_v31 = vld [vmem:[%s1484_s4 + $0x4] ss:$8 sm:$0xf]  ;;  %v1078_v34 = vld [vmem:[%s1484_s4 + $0x3] ss:$8 sm:$0xf] }
   0x7   :  { %v677_v27 = vrot.slane %v946_v16, %v1057_v26  ;;  %v447_v29 = vrot.slane %v943_v28, %v1038_v17  ;;  %v603_v30 = vrot.slane %v945_v19, %v1057_v26  ;;  %v374_v32 = vrot.slane %v942_v31, %v1038_v17  ;;  %v1088_v37 = vld [vmem:[%s1484_s4 + $0x2] ss:$8 sm:$0xf]  ;;  %s982_s21 = smov 2   ;;  %s986_s8 = smov 96  }
   0x8   :  { %v529_v33 = vrot.slane %v944_v24, %v1057_v26  ;;  %v300_v35 = vrot.slane %v1078_v34, %v1038_v17  ;;  %v455_v36 = vrot.slane %v943_v28, %v1057_v26  ;;  %v226_v38 = vrot.slane %v1088_v37, %v1038_v17  ;;  %v1099_v40 = vld [vmem:[%s1484_s4 + $0x1] ss:$8 sm:$0xf]  ;;  %s988_s10 = smov 111   ;;  %s989_s11 = smov 112  }
   0x9   :  { %v382_v39 = vrot.slane %v942_v31, %v1057_v26  ;;  %v152_v41 = vrot.slane %v1099_v40, %v1038_v17  ;;  %v665_v44 = vrot.slane %v946_v16, %v1040_v18  ;;  %v673_v45 = vrot.slane %v946_v16, %v1048_v22  ;;  %v47_v60 = vld [vmem:[%s1485_s0] sm:$0xff]  ;;  %v50_v9 = vld [vmem:[%s1485_s0 + $0x18] sm:$0xff]  ;;  %s984_s0 = smov 94  }
   0xa   :  { %v595_v46 = vrot.slane %v945_v19, %v1038_v17  ;;  %v517_v47 = vrot.slane %v944_v24, %v1040_v18  ;;  %v525_v48 = vrot.slane %v944_v24, %v1048_v22  ;;  %v443_v49 = vrot.slane %v943_v28, %v1040_v18 }
   0xb   :  { %v451_v50 = vrot.slane %v943_v28, %v1048_v22  ;;  %v370_v51 = vrot.slane %v942_v31, %v1040_v18  ;;  %v378_v52 = vrot.slane %v942_v31, %v1048_v22  ;;  %v296_v53 = vrot.slane %v1078_v34, %v1040_v18 }
   0xc   :  { %v304_v54 = vrot.slane %v1078_v34, %v1048_v22  ;;  %v222_v55 = vrot.slane %v1088_v37, %v1040_v18  ;;  %v230_v56 = vrot.slane %v1088_v37, %v1048_v22  ;;  %v148_v57 = vrot.slane %v1099_v40, %v1040_v18 }
   0xd   :  { %vm75_vm1 = vcmask 277640   ;;  %v160_v16 = vrot.slane %v1099_v40, %v1057_v26  ;;  %vm97_vm2 = vcmask 1047688   ;;  %vm317_vm3 = vcmask 130048  }
   0xe   :  { %76 = vst.msk [vmem:[#allocation2 + $0x20] sm:$0xff] %vm75_vm1, %v983_v58  ;;  %vm686_vm4 = vcmask 277504   ;;  %vm612_vm5 = vcmask 269312   ;;  %vm538_vm6 = vcmask 261120   ;;  %vm464_vm7 = vcmask 146432  }
   0xf   :  { %vm243_vm8 = vcmask 15360   ;;  %vm169_vm9 = vcmask 7168   ;;  %vm715_vm10 = vcmask 769024   ;;  %vm641_vm11 = vcmask 777216  }
  0x10   :  { %vm567_vm12 = vcmask 785408   ;;  %vm493_vm13 = vcmask 900096   ;;  %vm419_vm14 = vcmask 908288   ;;  %vm346_vm15 = vcmask 916480  }
  0x11   :  { %vm198_vm1 = vcmask 1039360  }
  0x78   :  { %v30_v3 = vpop.permute.xlu0 %29 }
  0x79   :  { %v32_v4 = vsub.f32 %v26_v1, %v30_v3 }
  0x7b   :  { %v33_v5 = vmax.f32 %v32_v4, 0.0 }
  0x7d   :  { %v34_v6 = vadd.f32 1e-05, %v33_v5 }
  0x7f   :  { %970 = vrsqrt.f32 %v34_v6 }
  0x8c   :  { %v971_v8 = vpop.eup %970 }
  0x8d   :  { %37 = vrot.lane.b32.xlu0 %v971_v8, %s974_s24  ;;  %v156_v8 = vrot.slane %v1099_v40, %v1048_v22 }
  0xff   :  { %v38_v11 = vpop.permute.xlu0 %37 }
 0x100   :  { %v40_v12 = vmul.f32 %v38_v11, %v24_v10 }
 0x102   :  { %v41_v13 = vmul.f32 %v40_v12, %v26_v1 }
 0x104   :  { %43 = vrot.lane.b32.xlu1 %v41_v13, %s972_s23  ;;  %v234_v13 = vrot.slane %v1088_v37, %v1057_v26 }
 0x108   :  { %53 = vperm.xlu1 %968, %v40_v12   ;;  %v308_v12 = vrot.slane %v1078_v34, %v1057_v26 }
 0x10c   :  { %680 = vrot.lane.b32.xlu1 %v669_v20, %s976_s3 }
 0x110   :  { %604 = vrot.lane.b32.xlu1 %v591_v21, %s977_s30 }
 0x114   :  { %608 = vrot.lane.b32.xlu1 %v599_v23, %s977_s30 }
 0x118   :  { %532 = vrot.lane.b32.xlu1 %v521_v25, %s978_s9 }
 0x11c   :  { %684 = vrot.lane.b32.xlu1 %v677_v27, %s976_s3 }
 0x120   :  { %458 = vrot.lane.b32.xlu1 %v447_v29, %s979_s12 }
 0x124   :  { %610 = vrot.lane.b32.xlu1 %v603_v30, %s977_s30 }
 0x128   :  { %385 = vrot.lane.b32.xlu1 %v374_v32, %s980_s15 }
 0x12c   :  { %536 = vrot.lane.b32.xlu1 %v529_v33, %s978_s9 }
 0x130   :  { %311 = vrot.lane.b32.xlu1 %v300_v35, %s981_s18 }
 0x134   :  { %462 = vrot.lane.b32.xlu1 %v455_v36, %s979_s12 }
 0x138   :  { %237 = vrot.lane.b32.xlu1 %v226_v38, %s982_s21 }
 0x13c   :  { %389 = vrot.lane.b32.xlu1 %v382_v39, %s980_s15 }
 0x140   :  { %163 = vrot.lane.b32.xlu1 %v152_v41, %s972_s23 }
 0x176   :  { %v44_v42 = vpop.permute.xlu1 %43 }
 0x177   :  { %v46_v43 = vsub.f32 %v24_v10, %v44_v42 }
 0x179   :  { %62 = vperm.xlu0 %969, %v46_v43  }
 0x17d   :  { %678 = vrot.lane.b32.xlu0 %v665_v44, %s976_s3 }
 0x181   :  { %682 = vrot.lane.b32.xlu0 %v673_v45, %s976_s3 }
 0x183   :  { %v54_v59 = vpop.permute.xlu1 %53 }
 0x184   :  { %v56_v63 = vmul.f32 %v54_v59, %v47_v60  ;;  %v58_v0 = vmul.f32 %v54_v59, %v49_v61  ;;  %v57_v2 = vmul.f32 %v54_v59, %v48_v62  ;;  %v59_v11 = vmul.f32 %v54_v59, %v50_v9 }
 0x185   :  { %606 = vrot.lane.b32.xlu0 %v595_v46, %s977_s30 }
 0x187   :  { %v1166_v19 = vpop.permute.xlu1 %680 }
 0x189   :  { %530 = vrot.lane.b32.xlu0 %v517_v47, %s978_s9 }
 0x18b   :  { %v1170_v21 = vpop.permute.xlu1 %604 }
 0x18d   :  { %534 = vrot.lane.b32.xlu0 %v525_v48, %s978_s9  ;;  %s987_s9 = smov 110  }
 0x18f   :  { %v1174_v24 = vpop.permute.xlu1 %608 }
 0x191   :  { %456 = vrot.lane.b32.xlu0 %v443_v49, %s979_s12 }
 0x193   :  { %v1178_v27 = vpop.permute.xlu1 %532 }
 0x195   :  { %460 = vrot.lane.b32.xlu0 %v451_v50, %s979_s12  ;;  %s990_s12 = smov 126  }
 0x197   :  { %v1182_v29 = vpop.permute.xlu1 %684 }
 0x199   :  { %383 = vrot.lane.b32.xlu0 %v370_v51, %s980_s15 }
 0x19b   :  { %v1186_v31 = vpop.permute.xlu1 %458 }
 0x19d   :  { %387 = vrot.lane.b32.xlu0 %v378_v52, %s980_s15 }
 0x19f   :  { %v1190_v33 = vpop.permute.xlu1 %610 }
 0x1a1   :  { %309 = vrot.lane.b32.xlu0 %v296_v53, %s981_s18 }
 0x1a3   :  { %v1194_v35 = vpop.permute.xlu1 %385 }
 0x1a5   :  { %313 = vrot.lane.b32.xlu0 %v304_v54, %s981_s18 }
 0x1a7   :  { %v1198_v37 = vpop.permute.xlu1 %536 }
 0x1a9   :  { %235 = vrot.lane.b32.xlu0 %v222_v55, %s982_s21 }
 0x1ab   :  { %v1202_v39 = vpop.permute.xlu1 %311 }
 0x1ad   :  { %239 = vrot.lane.b32.xlu0 %v230_v56, %s982_s21 }
 0x1af   :  { %v1206_v41 = vpop.permute.xlu1 %462 }
 0x1b1   :  { %161 = vrot.lane.b32.xlu0 %v148_v57, %s972_s23 }
 0x1b3   :  { %v1210_v43 = vpop.permute.xlu1 %237 }
 0x1b7   :  { %v1214_v45 = vpop.permute.xlu1 %389 }
 0x1bb   :  { %v1218_v47 = vpop.permute.xlu1 %163 }
 0x1f4   :  { %v63_v1 = vpop.permute.xlu0 %62 }
 0x1f5   :  { %v67_v3 = vadd.f32 %v63_v1, %v58_v0  ;;  %v65_v4 = vadd.f32 %v63_v1, %v56_v63  ;;  %v66_v7 = vadd.f32 %v63_v1, %v57_v2  ;;  %v68_v14 = vadd.f32 %v63_v1, %v59_v11 }
 0x1f7   :  { %v71_v5 = vmax.f32 %v67_v3, 0.0  ;;  %v69_v6 = vmax.f32 %v65_v4, 0.0  ;;  %v70_v10 = vmax.f32 %v66_v7, 0.0  ;;  %v72_v15 = vmax.f32 %v68_v14, 0.0 }
 0x1f8   :  { %v1168_v20 = vpop.permute.xlu0 %678 }
 0x1f9   :  { %85 = vrot.lane.b32.xlu0 %v71_v5, %s980_s15  ;;  %81 = vrot.lane.b32.xlu1 %v69_v6, %s980_s15 }
 0x1fc   :  { %v1172_v23 = vpop.permute.xlu0 %682 }
 0x1fd   :  { %165 = vrot.lane.b32.xlu0 %v156_v8, %s972_s23  ;;  %83 = vrot.lane.b32.xlu1 %v70_v10, %s980_s15  ;;  %v687_v10 = vsel %vm686_vm4, %v1168_v20, %v1166_v19 }
 0x200   :  { %v1176_v25 = vpop.permute.xlu0 %606 }
 0x201   :  { %315 = vrot.lane.b32.xlu1 %v308_v12, %s981_s18  ;;  %241 = vrot.lane.b32.xlu0 %v234_v13, %s982_s21  ;;  %v614_v14 = vsel %vm612_vm5, %v1176_v25, %v1174_v24 }
 0x204   :  { %v1180_v28 = vpop.permute.xlu0 %530 }
 0x205   :  { %87 = vrot.lane.b32.xlu1 %v72_v15, %s980_s15 }
 0x208   :  { %v1184_v30 = vpop.permute.xlu0 %534 }
 0x209   :  { %167 = vrot.lane.b32.xlu1 %v160_v16, %s972_s23  ;;  %s985_s23 = smov 95  }
 0x20c   :  { %v1188_v32 = vpop.permute.xlu0 %456 }
 0x210   :  { %v1192_v34 = vpop.permute.xlu0 %460 }
 0x214   :  { %v1196_v36 = vpop.permute.xlu0 %383 }
 0x218   :  { %v1200_v38 = vpop.permute.xlu0 %387 }
 0x21c   :  { %v1204_v40 = vpop.permute.xlu0 %309 }
 0x220   :  { %v1208_v42 = vpop.permute.xlu0 %313 }
 0x224   :  { %v1212_v44 = vpop.permute.xlu0 %235 }
 0x228   :  { %v1216_v46 = vpop.permute.xlu0 %239 }
 0x22c   :  { %v1220_v48 = vpop.permute.xlu0 %161 }
 0x26b   :  { %v82_v49 = vpop.permute.xlu1 %81  ;;  %v86_v50 = vpop.permute.xlu0 %85 }
 0x26c   :  { %98 = vst.msk [vmem:[#allocation2] sm:$0xff] %vm97_vm2, %v82_v49  ;;  %vm765_vm2 = vcmask 588800  }
 0x26f   :  { %v84_v51 = vpop.permute.xlu1 %83  ;;  %v1282_v11 = vpop.permute.xlu0 %165 }
 0x270   :  { %v1223_v52 = vsel %vm73_vm0, %v82_v49, %v84_v51  ;;  %v1226_v53 = vsel %vm73_vm0, %v84_v51, %v86_v50  ;;  %v688_v49 = vsel %vm686_vm4, %v1166_v19, %v1172_v23  ;;  %v613_v19 = vsel %vm612_vm5, %v1170_v21, %v1176_v25 }
 0x271   :  { %v696_v13 = vmul.f32 %v687_v10, %v1223_v52  ;;  %v465_v25 = vsel %vm464_vm7, %v1188_v32, %v1186_v31 }
 0x273   :  { %v316_v54 = vpop.permute.xlu1 %315  ;;  %v1228_v55 = vld [vmem:[#allocation2] sm:$0xff]  ;;  %v242_v15 = vpop.permute.xlu0 %241 }
 0x274   :  { %v695_v56 = vmul.f32 %v1168_v20, %v1228_v55  ;;  %v621_v57 = vmul.f32 %v1228_v55, %v1170_v21  ;;  %v547_v60 = vmul.f32 %v1228_v55, %v1180_v28  ;;  %v320_v61 = vsel %vm317_vm3, %v1208_v42, %v316_v54 }
 0x275   :  { %v473_v2 = vmul.f32 %v1228_v55, %v1188_v32  ;;  %v399_v3 = vmul.f32 %v1228_v55, %v1196_v36  ;;  %v326_v6 = vmul.f32 %v1228_v55, %v1204_v40  ;;  %v252_v7 = vmul.f32 %v1228_v55, %v1212_v44 }
 0x276   :  { %705 = vrot.lane.b32.xlu0 %v695_v56, %s984_s0  ;;  %631 = vrot.lane.b32.xlu1 %v621_v57, %s985_s23  ;;  %v178_v12 = vmul.f32 %v1228_v55, %v1220_v48  ;;  %v623_v20 = vmul.f32 %v614_v14, %v1226_v53  ;;  %v689_v56 = vsel %vm686_vm4, %v1172_v23, %v1182_v29 }
 0x277   :  { %v88_v58 = vpop.permute.xlu1 %87  ;;  %v622_v57 = vmul.f32 %v613_v19, %v1223_v52  ;;  %v466_v23 = vsel %vm464_vm7, %v1186_v31, %v1192_v34  ;;  %v541_v31 = vsel %vm538_vm6, %v1184_v30, %v1198_v37 }
 0x278   :  { %v1237_v59 = vsel %vm73_vm0, %v86_v50, %v88_v58  ;;  %102 = vst.msk [vmem:[#allocation2 + $0x20] sm:$0xff] %vm73_vm0, %v88_v58  ;;  %v539_v50 = vsel %vm538_vm6, %v1180_v28, %v1178_v27  ;;  %v540_v58 = vsel %vm538_vm6, %v1178_v27, %v1184_v30  ;;  %v475_v21 = vmul.f32 %v466_v23, %v1226_v53 }
 0x279   :  { %v1246_v62 = vmul.f32 %v320_v61, %v1237_v59  ;;  %v548_v51 = vmul.f32 %v539_v50, %v1223_v52  ;;  %v698_v28 = vmul.f32 %v689_v56, %v1237_v59  ;;  %v391_v27 = vsel %vm73_vm0, %v1196_v36, %v1194_v35 }
 0x27a   :  { %557 = vrot.lane.b32.xlu0 %v547_v60, %s986_s8  ;;  %v474_v60 = vmul.f32 %v465_v25, %v1223_v52  ;;  %v400_v61 = vmul.f32 %v391_v27, %v1223_v52  ;;  %v550_v36 = vmul.f32 %v541_v31, %v1237_v59 }
 0x27f   :  { %v1248_v63 = vld [vmem:[#allocation2 + $0x20] sm:$0xff] }
 0x280   :  { %v699_v0 = vmul.f32 %v1182_v29, %v1248_v63  ;;  %v625_v1 = vmul.f32 %v1190_v33, %v1248_v63  ;;  %v551_v4 = vmul.f32 %v1198_v37, %v1248_v63  ;;  %v477_v5 = vmul.f32 %v1206_v41, %v1248_v63 }
 0x281   :  { %v403_v8 = vmul.f32 %v1214_v45, %v1248_v63  ;;  %v330_v9 = vmul.f32 %v316_v54, %v1248_v63  ;;  %v256_v16 = vmul.f32 %v242_v15, %v1248_v63  ;;  %v697_v54 = vmul.f32 %v688_v49, %v1226_v53 }
 0x282   :  { %713 = vrot.lane.b32.xlu1 %v699_v0, %s984_s0  ;;  %639 = vrot.lane.b32.xlu0 %v625_v1, %s985_s23  ;;  %v549_v29 = vmul.f32 %v540_v58, %v1226_v53  ;;  %v615_v0 = vsel %vm612_vm5, %v1174_v24, %v1190_v33  ;;  %v392_v1 = vsel %vm73_vm0, %v1194_v35, %v1200_v38 }
 0x283   :  { %v624_v32 = vmul.f32 %v615_v0, %v1237_v59  ;;  %v319_v24 = vsel %vm317_vm3, %v1202_v39, %v1208_v42  ;;  %v401_v33 = vmul.f32 %v392_v1, %v1226_v53  ;;  %v318_v37 = vsel %vm317_vm3, %v1204_v40, %v1202_v39 }
 0x284   :  { %v328_v30 = vmul.f32 %v319_v24, %v1226_v53  ;;  %v244_v35 = vsel %vm243_vm8, %v1212_v44, %v1210_v43  ;;  %v393_v39 = vsel %vm73_vm0, %v1200_v38, %v1214_v45  ;;  %v246_v45 = vsel %vm243_vm8, %v1216_v46, %v242_v15 }
 0x285   :  { %v253_v42 = vmul.f32 %v244_v35, %v1223_v52  ;;  %v402_v44 = vmul.f32 %v393_v39, %v1237_v59  ;;  %vm272_vm0 = vcmask 1031168  }
 0x286   :  { %483 = vrot.lane.b32.xlu1 %v473_v2, %s987_s9  ;;  %409 = vrot.lane.b32.xlu0 %v399_v3, %s988_s10  ;;  %v327_v2 = vmul.f32 %v318_v37, %v1223_v52  ;;  %v467_v3 = vsel %vm464_vm7, %v1192_v34, %v1206_v41  ;;  %v245_v34 = vsel %vm243_vm8, %v1210_v43, %v1216_v46 }
 0x287   :  { %v476_v40 = vmul.f32 %v467_v3, %v1237_v59  ;;  %v254_v41 = vmul.f32 %v245_v34, %v1226_v53 }
 0x28a   :  { %565 = vrot.lane.b32.xlu1 %v551_v4, %s986_s8  ;;  %491 = vrot.lane.b32.xlu0 %v477_v5, %s987_s9  ;;  %v171_v4 = vsel %vm169_vm9, %v1218_v47, %v1282_v11  ;;  %v168_v5 = vpop.permute.xlu1 %167 }
 0x28b   :  { %v180_v38 = vmul.f32 %v171_v4, %v1226_v53 }
 0x28e   :  { %336 = vrot.lane.b32.xlu1 %v326_v6, %s989_s11  ;;  %262 = vrot.lane.b32.xlu0 %v252_v7, %s990_s12  ;;  %v170_v6 = vsel %vm169_vm9, %v1220_v48, %v1218_v47  ;;  %v255_v7 = vmul.f32 %v246_v45, %v1237_v59  ;;  %v182_v47 = vmul.f32 %v1248_v63, %v168_v5 }
 0x28f   :  { %v179_v43 = vmul.f32 %v170_v6, %v1223_v52 }
 0x292   :  { %417 = vrot.lane.b32.xlu1 %v403_v8, %s988_s10  ;;  %344 = vrot.lane.b32.xlu0 %v330_v9, %s989_s11  ;;  %v172_v8 = vsel %vm169_vm9, %v1282_v11, %v168_v5 }
 0x293   :  { %v181_v46 = vmul.f32 %v172_v8, %v1237_v59 }
 0x296   :  { %188 = vrot.lane.b32.xlu1 %v178_v12, %s974_s24  ;;  %707 = vrot.lane.b32.xlu0 %v696_v13, %s984_s0 }
 0x29a   :  { %635 = vrot.lane.b32.xlu0 %v623_v20, %s985_s23  ;;  %270 = vrot.lane.b32.xlu1 %v256_v16, %s990_s12 }
 0x29e   :  { %559 = vrot.lane.b32.xlu0 %v548_v51, %s986_s8  ;;  %709 = vrot.lane.b32.xlu1 %v697_v54, %s984_s0 }
 0x2a2   :  { %633 = vrot.lane.b32.xlu1 %v622_v57, %s985_s23  ;;  %711 = vrot.lane.b32.xlu0 %v698_v28, %s984_s0 }
 0x2a6   :  { %561 = vrot.lane.b32.xlu1 %v549_v29, %s986_s8  ;;  %487 = vrot.lane.b32.xlu0 %v475_v21, %s987_s9 }
 0x2aa   :  { %485 = vrot.lane.b32.xlu1 %v474_v60, %s987_s9  ;;  %411 = vrot.lane.b32.xlu0 %v400_v61, %s988_s10 }
 0x2ae   :  { %637 = vrot.lane.b32.xlu1 %v624_v32, %s985_s23  ;;  %563 = vrot.lane.b32.xlu0 %v550_v36, %s986_s8 }
 0x2b2   :  { %413 = vrot.lane.b32.xlu1 %v401_v33, %s988_s10  ;;  %340 = vrot.lane.b32.xlu0 %v328_v30, %s989_s11 }
 0x2b6   :  { %338 = vrot.lane.b32.xlu1 %v327_v2, %s989_s11  ;;  %264 = vrot.lane.b32.xlu0 %v253_v42, %s990_s12 }
 0x2ba   :  { %489 = vrot.lane.b32.xlu1 %v476_v40, %s987_s9  ;;  %415 = vrot.lane.b32.xlu0 %v402_v44, %s988_s10 }
 0x2be   :  { %266 = vrot.lane.b32.xlu1 %v254_v41, %s990_s12  ;;  %192 = vrot.lane.b32.xlu0 %v180_v38, %s974_s24 }
 0x2c2   :  { %190 = vrot.lane.b32.xlu1 %v179_v43, %s974_s24  ;;  %268 = vrot.lane.b32.xlu0 %v255_v7, %s990_s12 }
 0x2c6   :  { %342 = vrot.lane.b32.xlu1 %v1246_v62, %s989_s11  ;;  %194 = vrot.lane.b32.xlu0 %v181_v46, %s974_s24  ;;  %v107_v46 = vld [vmem:[%s1484_s4] ss:$8 sm:$0xf] }
 0x2ca   :  { %196 = vrot.lane.b32.xlu1 %v182_v47, %s974_s24 }
 0x2e8   :  { %v706_v48 = vpop.permute.xlu0 %705  ;;  %v632_v9 = vpop.permute.xlu1 %631 }
 0x2ec   :  { %v558_v10 = vpop.permute.xlu0 %557 }
 0x2f4   :  { %v640_v12 = vpop.permute.xlu0 %639  ;;  %v714_v11 = vpop.permute.xlu1 %713 }
 0x2f8   :  { %v410_v13 = vpop.permute.xlu0 %409  ;;  %v484_v14 = vpop.permute.xlu1 %483 }
 0x2fc   :  { %v1403_v15 = vpop.permute.xlu0 %491  ;;  %v566_v16 = vpop.permute.xlu1 %565 }
 0x300   :  { %v1405_v20 = vpop.permute.xlu0 %262  ;;  %v337_v49 = vpop.permute.xlu1 %336 }
 0x304   :  { %v1407_v62 = vpop.permute.xlu0 %344  ;;  %v1409_v50 = vpop.permute.xlu1 %417 }
 0x308   :  { %v708_v63 = vpop.permute.xlu0 %707  ;;  %v1411_v51 = vpop.permute.xlu1 %188 }
 0x309   :  { %v716_v58 = vsel %vm715_vm10, %v706_v48, %v708_v63 }
 0x30c   :  { %v636_v54 = vpop.permute.xlu0 %635  ;;  %v1413_v56 = vpop.permute.xlu1 %270 }
 0x310   :  { %v560_v19 = vpop.permute.xlu0 %559  ;;  %v710_v57 = vpop.permute.xlu1 %709 }
 0x311   :  { %v717_v28 = vsel %vm715_vm10, %v708_v63, %v710_v57  ;;  %v568_v32 = vsel %vm567_vm12, %v558_v10, %v560_v19 }
 0x312   :  { %783 = vmatprep.subr.mxu0 %v717_v28 }
 0x313   :  { %784 = vmatpush1.msra.mxu0 %v716_v58 }
 0x314   :  { %v712_v23 = vpop.permute.xlu0 %711  ;;  %v634_v29 = vpop.permute.xlu1 %633 }
 0x315   :  { %v643_v21 = vsel %vm641_vm11, %v634_v29, %v636_v54  ;;  %v719_v25 = vsel %vm715_vm10, %v712_v23, %v714_v11  ;;  %v642_v27 = vsel %vm641_vm11, %v632_v9, %v634_v29  ;;  %v718_v60 = vsel %vm715_vm10, %v710_v57, %v712_v23 }
 0x316   :  { %785 = vmatprep.subr.mxu0 %v643_v21  ;;  %854 = vmatprep.subr.mxu1 %v719_v25  ;;  %v116_v11 = vrot.slane %v107_v46, %v1038_v17  ;;  %v728_v17 = vld [vmem:[%s1486_s1] sm:$0xff] }
 0x317   :  { %786 = vmatpush1.msra.mxu0 %v642_v27  ;;  %855 = vmatpush1.msra.mxu1 %v718_v60 }
 0x318   :  { %v488_v61 = vpop.permute.xlu0 %487  ;;  %v562_v0 = vpop.permute.xlu1 %561 }
 0x319   :  { %v569_v31 = vsel %vm567_vm12, %v560_v19, %v562_v0  ;;  %v120_v19 = vrot.slane %v107_v46, %v1048_v22 }
 0x31a   :  { %787 = vmatprep.subr.mxu0 %v569_v31 }
 0x31b   :  { %788 = vmatpush1.msra.mxu0 %v568_v32 }
 0x31c   :  { %v412_v36 = vpop.permute.xlu0 %411  ;;  %v486_v1 = vpop.permute.xlu1 %485 }
 0x31d   :  { %v495_v24 = vsel %vm493_vm13, %v486_v1, %v488_v61  ;;  %v494_v33 = vsel %vm493_vm13, %v484_v14, %v486_v1  ;;  %v420_v4 = vsel %vm419_vm14, %v410_v13, %v412_v36  ;;  %v112_v13 = vrot.slane %v107_v46, %v1040_v18 }
 0x31e   :  { %789 = vmatprep.subr.mxu0 %v495_v24 }
 0x31f   :  { %790 = vmatpush1.msra.mxu0 %v494_v33  ;;  %v129_v63 = vmul.f32 %v1228_v55, %v112_v13 }
 0x320   :  { %v564_v30 = vpop.permute.xlu0 %563  ;;  %v638_v37 = vpop.permute.xlu1 %637 }
 0x321   :  { %v645_v35 = vsel %vm641_vm11, %v638_v37, %v640_v12  ;;  %v644_v2 = vsel %vm641_vm11, %v636_v54, %v638_v37  ;;  %v571_v42 = vsel %vm567_vm12, %v564_v30, %v566_v16  ;;  %v570_v40 = vsel %vm567_vm12, %v562_v0, %v564_v30 }
 0x322   :  { %856 = vmatprep.subr.mxu1 %v645_v35 }
 0x323   :  { %857 = vmatpush1.msra.mxu1 %v644_v2 }
 0x324   :  { %v341_v3 = vpop.permute.xlu0 %340  ;;  %858 = vmatprep.subr.mxu1 %v571_v42  ;;  %v414_v39 = vpop.permute.xlu1 %413 }
 0x325   :  { %859 = vmatpush1.msra.mxu1 %v570_v40  ;;  %v421_v44 = vsel %vm419_vm14, %v412_v36, %v414_v39 }
 0x326   :  { %791 = vmatprep.subr.mxu0 %v421_v44 }
 0x327   :  { %792 = vmatpush1.msra.mxu0 %v420_v4 }
 0x328   :  { %v265_v34 = vpop.permute.xlu0 %264  ;;  %v339_v41 = vpop.permute.xlu1 %338 }
 0x329   :  { %v348_v38 = vsel %vm346_vm15, %v339_v41, %v341_v3  ;;  %v347_v45 = vsel %vm346_vm15, %v337_v49, %v339_v41  ;;  %v273_v12 = vsel %vm272_vm0, %v1405_v20, %v265_v34 }
 0x32a   :  { %793 = vmatprep.subr.mxu0 %v348_v38 }
 0x32b   :  { %794 = vmatpush1.msra.mxu0 %v347_v45 }
 0x32c   :  { %v416_v5 = vpop.permute.xlu0 %415  ;;  %v490_v6 = vpop.permute.xlu1 %489 }
 0x32d   :  { %v497_v7 = vsel %vm493_vm13, %v490_v6, %v1403_v15  ;;  %v496_v43 = vsel %vm493_vm13, %v488_v61, %v490_v6  ;;  %v423_v8 = vsel %vm419_vm14, %v416_v5, %v1409_v50  ;;  %v422_v9 = vsel %vm419_vm14, %v414_v39, %v416_v5 }
 0x32e   :  { %860 = vmatprep.subr.mxu1 %v497_v7  ;;  %v130_v50 = vmul.f32 %v116_v11, %v1223_v52  ;;  %v124_v52 = vrot.slane %v107_v46, %v1057_v26  ;;  %v131_v26 = vmul.f32 %v120_v19, %v1226_v53 }
 0x32f   :  { %861 = vmatpush1.msra.mxu1 %v496_v43 }
 0x330   :  { %v193_v47 = vpop.permute.xlu0 %192  ;;  %862 = vmatprep.subr.mxu1 %v423_v8  ;;  %v267_v48 = vpop.permute.xlu1 %266  ;;  %v132_v23 = vmul.f32 %v124_v52, %v1237_v59 }
 0x331   :  { %863 = vmatpush1.msra.mxu1 %v422_v9  ;;  %v274_v10 = vsel %vm272_vm0, %v265_v34, %v267_v48 }
 0x332   :  { %795 = vmatprep.subr.mxu0 %v274_v10 }
 0x333   :  { %796 = vmatpush1.msra.mxu0 %v273_v12 }
 0x334   :  { %v191_v14 = vpop.permute.xlu1 %190  ;;  %v269_v15 = vpop.permute.xlu0 %268 }
 0x335   :  { %v200_v16 = vsel %vm198_vm1, %v191_v14, %v193_v47  ;;  %v199_v49 = vsel %vm198_vm1, %v1411_v51, %v191_v14  ;;  %v276_v55 = vsel %vm272_vm0, %v269_v15, %v1413_v56  ;;  %v275_v28 = vsel %vm272_vm0, %v267_v48, %v269_v15 }
 0x336   :  { %797 = vmatprep.subr.mxu0 %v200_v16 }
 0x337   :  { %798 = vmatpush1.msra.mxu0 %v199_v49 }
 0x338   :  { %799 = vmatprep.subr.mxu0 %v130_v50  ;;  %v343_v18 = vpop.permute.xlu1 %342  ;;  %v195_v51 = vpop.permute.xlu0 %194 }
 0x339   :  { %800 = vmatpush1.msra.mxu0 %v129_v63  ;;  %v350_v20 = vsel %vm346_vm15, %v343_v18, %v1407_v62  ;;  %v349_v54 = vsel %vm346_vm15, %v341_v3, %v343_v18  ;;  %v201_v58 = vsel %vm198_vm1, %v193_v47, %v195_v51 }
 0x33a   :  { %864 = vmatprep.subr.mxu1 %v350_v20  ;;  %947 = vmatmul.mubr.msk.f32.vlgmr.msra.gmra.mxu0 %vm765_vm2, %v728_v17 }
 0x33b   :  { %865 = vmatpush1.msra.mxu1 %v349_v54 }
 0x33c   :  { %866 = vmatprep.subr.mxu1 %v276_v55  ;;  %v197_v57 = vpop.permute.xlu1 %196 }
 0x33d   :  { %867 = vmatpush1.msra.mxu1 %v275_v28  ;;  %v202_v62 = vsel %vm198_vm1, %v195_v51, %v197_v57 }
 0x33e   :  { %868 = vmatprep.subr.mxu1 %v202_v62 }
 0x33f   :  { %869 = vmatpush1.msra.mxu1 %v201_v58 }
 0x340   :  { %870 = vmatprep.subr.mxu1 %v132_v23 }
 0x341   :  { %871 = vmatpush1.msra.mxu1 %v131_v26 }
 0x342   :  { %948 = vmatmul.mubr.msk.f32.vlgmr.msra.gmra.mxu1 %vm765_vm2, %v728_v17 }
 0x3fa   :  { %v835_v22 = vpop.f32.mrf.mxu0 }
 0x3fb   :  { %911 = vst [vmem:[%s1487_s5] sm:$0xff] %v835_v22  ;;  %v920_v29 = vmul.f32 %v835_v22, %v835_v22 }
 0x3fc   :  { %v837_v56 = vpop.f32.mrf.mxu0 }
 0x3fd   :  { %912 = vst [vmem:[%s1487_s5 + $0x8] sm:$0xff] %v837_v56  ;;  %v921_v21 = vmul.f32 %v837_v56, %v837_v56  ;;  %v915_v59 = vadd.f32 %v837_v56, %v835_v22 }
 0x3ff   :  { %v924_v27 = vadd.f32 %v921_v21, %v920_v29 }
 0x402   :  { %v906_v25 = vpop.f32.mrf.mxu1 }
 0x403   :  { %913 = vst [vmem:[%s1487_s5 + $0x10] sm:$0xff] %v906_v25  ;;  %v922_v53 = vmul.f32 %v906_v25, %v906_v25  ;;  %v916_v60 = vadd.f32 %v915_v59, %v906_v25 }
 0x404   :  { %v908_v61 = vpop.f32.mrf.mxu1 }
 0x405   :  { %914 = vst [vmem:[%s1487_s5 + $0x18] sm:$0xff] %v908_v61  ;;  %v923_v0 = vmul.f32 %v908_v61, %v908_v61  ;;  %v917_v31 = vadd.f32 %v916_v60, %v908_v61  ;;  %v925_v32 = vadd.f32 %v924_v27, %v922_v53 }
 0x407   :  { %918 = vadd.xlane.f32.xlu0 %v917_v31  ;;  %v926_v36 = vadd.f32 %v925_v32, %v923_v0 }
 0x409   :  { %927 = vadd.xlane.f32.xlu1 %v926_v36 }
 0x490   :  { %v919_v1 = vpop.xlane.xlu0 %918 }
 0x492   :  { %v928_v24 = vpop.xlane.xlu1 %927 }
 0x493   :  { %v929_v33 = vsel %vm169_vm9, %v919_v1, %v928_v24 }
 0x494   :  { %930 = vst.msk [vmem:[%s1488_s6] sm:$0xff] %vm243_vm8, %v929_v33 }

</bundles_post_ra>
